<compile_context>
chip_gen: v6e
topology: v6e:2x2x1
jax: 0.10.0
libtpu: 0.0.40
codegen_flags: <defaults>
</compile_context>

<pallas_src>
import functools
import numpy as np
import jax
import jax.numpy as jnp
from jax import lax
from jax.experimental import pallas as pl
from jax.experimental.pallas import tpu as pltpu

EPS = 1e-5


def _make_divisible(v, divisor=8, min_value=None):
    if min_value is None:
        min_value = divisor
    new_v = max(min_value, int(v + divisor / 2) // divisor * divisor)
    if new_v < 0.9 * v:
        new_v += divisor
    return new_v


def _split_channels(num_chan, num_groups):
    split = [num_chan // num_groups for _ in range(num_groups)]
    split[0] += num_chan - sum(split)
    return split


# ----------------------------- static config ----------------------------------
IN_CH = _make_divisible(16 * 1.0, 8)        # 16
OUT_CH = _make_divisible(16 * 1.0, 8)       # 16
EXPAND_RATIO = 3
EXP_CH = int(IN_CH * EXPAND_RATIO)          # 48
DW_KS = [3, 5]
DW_SPLITS = _split_channels(EXP_CH, len(DW_KS))   # [24, 24]
PROJ_IN_SPLITS = _split_channels(EXP_CH, 2)       # [24, 24]
PROJ_OUT_SPLITS = _split_channels(OUT_CH, 2)      # [8, 8]
N_CENTER = 9                                      # 3x3 centre of the 5x5 tap grid
N_OUTER = 16                                      # ring of the 5x5 tap grid


# ----------------------------- depthwise tap tables ----------------------------

def _center_outer_taps():
    """Fixed ordering of 5x5 taps: centre (2,2) first, then rest of 3x3 core,
    then the 16 outer-ring taps (only the 5x5 channel group uses those)."""
    center = [(2, 2)] + [(kh, kw) for kh in range(1, 4) for kw in range(1, 4)
                         if (kh, kw) != (2, 2)]
    outer = [(kh, kw) for kh in range(5) for kw in range(5)
             if not (1 <= kh <= 3 and 1 <= kw <= 3)]
    return center, outer


def _tap_mask(kh, kw, H, W):
    """Boundary mask (P,) in output-pixel order for tap (kh, kw) of a 5x5 conv
    with padding 2 (also kills the row wrap introduced by the flat lane roll)."""
    hh = np.arange(H)
    ww = np.arange(W)
    mh = (hh + kh - 2 >= 0) & (hh + kh - 2 < H)
    mw = (ww + kw - 2 >= 0) & (ww + kw - 2 < W)
    return (mh[:, None] & mw[None, :]).astype(np.float32).ravel()


def _tap_shift(kh, kw, H, W):
    """Static lane-roll amount so rolled[p] = he[p + flat_offset(kh,kw)]."""
    off = (kh - 2) * W + (kw - 2)
    return (-off) % (H * W)


# ----------------------------- fused Pallas kernel -----------------------------

def _mixnet_block_kernel(x_ref, we_ref, b1_ref, wmc_ref, wmo_ref, b2_ref,
                         wp0_ref, wp1_ref, b3_ref, o_ref, *,
                         center_shifts, outer_shifts, dw_dtype):
    # Channel-major layout: rows = channels (sublanes), cols = H*W pixels (lanes).
    g3 = DW_SPLITS[0]
    we = we_ref[...]                    # (Cexp, Cin)   bf16 (pre-cast on host)
    b1 = b1_ref[...]                    # (Cexp, 1)     f32
    b2 = b2_ref[...]                    # (Cexp, 1)     dw_dtype
    wp0 = wp0_ref[...]                  # (Co0, Ci0)    bf16
    wp1 = wp1_ref[...]                  # (Co1, Ci1)    bf16
    b3 = b3_ref[...]                    # (Cout, 1)     f32

    nb = x_ref.shape[0]                 # images packed into this grid step
    for b in range(nb):
        x = x_ref[b]                                            # (Cin, P) bf16

        # 1) pointwise expansion (BN scale folded) + ReLU.  bf16 MXU, f32 acc.
        he = jnp.dot(we, x, preferred_element_type=jnp.float32)  # (Cexp, P)
        he = jnp.maximum(he + b1, 0.0).astype(dw_dtype)
        he5 = he[g3:, :]                                         # 5x5 group slab

        # 2a) 9 centre taps over all channels.  Each tap = static lane roll
        #     (XLU slot) * precombined mask-x-weight tensor (single VALU mul).
        #     acc0 is seeded by the shift-0 centre tap, acc1 by the BN bias;
        #     two accumulators break the dependence chain.
        acc0 = he * wmc_ref[0]
        acc1 = jnp.broadcast_to(b2, he.shape)
        for t in range(1, len(center_shifts)):
            s = center_shifts[t]
            rolled = pltpu.roll(he, shift=s, axis=1) if s else he
            contrib = rolled * wmc_ref[t]
            if t % 2 == 0:
                acc0 = acc0 + contrib
            else:
                acc1 = acc1 + contrib

        # 2b) 16 outer taps only touch the 5x5 channel group (the 3x3 group's
        #     outer taps are structurally zero -> skipped entirely).
        acco0 = pltpu.roll(he5, shift=outer_shifts[0], axis=1) * wmo_ref[0]
        acco1 = pltpu.roll(he5, shift=outer_shifts[1], axis=1) * wmo_ref[1]
        for t in range(2, len(outer_shifts)):
            rolled = pltpu.roll(he5, shift=outer_shifts[t], axis=1)
            contrib = rolled * wmo_ref[t]
            if t % 2 == 0:
                acco0 = acco0 + contrib
            else:
                acco1 = acco1 + contrib

        hd_lo = jnp.maximum(acc0[:g3] + acc1[:g3], 0.0)          # (24, P)
        hd_hi = jnp.maximum(acc0[g3:] + acc1[g3:] + (acco0 + acco1), 0.0)

        # 3) grouped 1x1 projection as two small dots (BN folded) + residual
        #    (residual add in f32; lane-dense store).
        out_lo = jnp.dot(wp0, hd_lo.astype(jnp.bfloat16),
                         preferred_element_type=jnp.float32)     # (8, P)
        out_hi = jnp.dot(wp1, hd_hi.astype(jnp.bfloat16),
                         preferred_element_type=jnp.float32)     # (8, P)
        out = jnp.concatenate([out_lo, out_hi], axis=0) + b3
        o_ref[b] = (out + x).astype(o_ref.dtype)


def _pick_batch_block(n):
    """Images per grid step: amortize per-step pipeline overhead, but keep
    >=2 grid steps so both v7x TensorCores get work ("parallel" axis)."""
    target = min(max(1, n // 2), 4)
    for nb in range(target, 0, -1):
        if n % nb == 0:
            return nb
    return 1


def mixnet_block_forward(x_nchw, p):
    N, Cin, H, W = x_nchw.shape
    P = H * W
    dw_dtype = p['wm_center'].dtype      # static under jit
    # Contiguous reshape (free); cast x to bf16 in the wrapper (halves input DMA,
    # removes the in-kernel cast).  Residual add stays f32 inside the kernel.
    x = x_nchw.reshape(N, Cin, P).astype(jnp.bfloat16)

    center, outer = _center_outer_taps()
    c_shifts = tuple(_tap_shift(kh, kw, H, W) for kh, kw in center)
    o_shifts = tuple(_tap_shift(kh, kw, H, W) for kh, kw in outer)

    NB = _pick_batch_block(N)
    kernel = functools.partial(_mixnet_block_kernel,
                               center_shifts=c_shifts,
                               outer_shifts=o_shifts,
                               dw_dtype=dw_dtype)
    out = pl.pallas_call(
        kernel,
        out_shape=jax.ShapeDtypeStruct((N, OUT_CH, P), jnp.float32),
        grid=(N // NB,),
        in_specs=[
            pl.BlockSpec((NB, Cin, P), lambda n: (n, 0, 0)),               # x (bf16)
            pl.BlockSpec((EXP_CH, IN_CH), lambda n: (0, 0)),               # w_exp bf16
            pl.BlockSpec((EXP_CH, 1), lambda n: (0, 0)),                   # b1
            pl.BlockSpec((N_CENTER, EXP_CH, P), lambda n: (0, 0, 0)),      # wm_center
            pl.BlockSpec((N_OUTER, DW_SPLITS[1], P), lambda n: (0, 0, 0)), # wm_outer
            pl.BlockSpec((EXP_CH, 1), lambda n: (0, 0)),                   # b2
            pl.BlockSpec((PROJ_OUT_SPLITS[0], PROJ_IN_SPLITS[0]), lambda n: (0, 0)),
            pl.BlockSpec((PROJ_OUT_SPLITS[1], PROJ_IN_SPLITS[1]), lambda n: (0, 0)),
            pl.BlockSpec((OUT_CH, 1), lambda n: (0, 0)),                   # b3
        ],
        out_specs=pl.BlockSpec((NB, OUT_CH, P), lambda n: (n, 0, 0)),
        compiler_params=pltpu.CompilerParams(dimension_semantics=("parallel",)),
    )(x, p['w_exp'], p['b1'], p['wm_center'], p['wm_outer'], p['b2'],
      p['w_p0'], p['w_p1'], p['b3'])
    return out.reshape(N, OUT_CH, H, W)


# ----------------------------- parameters -------------------------------------

def init_raw_params(key):
    ks = jax.random.split(key, 20)
    raw = {}
    raw['w_exp'] = jax.random.normal(ks[0], (EXP_CH, IN_CH, 1, 1), jnp.float32) * 0.1
    raw['g1'] = 1.0 + 0.1 * jax.random.normal(ks[1], (EXP_CH,), jnp.float32)
    raw['b1'] = 0.1 * jax.random.normal(ks[2], (EXP_CH,), jnp.float32)
    raw['m1'] = 0.1 * jax.random.normal(ks[3], (EXP_CH,), jnp.float32)
    raw['v1'] = jax.random.uniform(ks[4], (EXP_CH,), jnp.float32, 0.5, 1.5)

    raw['w_dw3'] = jax.random.normal(ks[5], (DW_SPLITS[0], 1, 3, 3), jnp.float32) * 0.1
    raw['w_dw5'] = jax.random.normal(ks[6], (DW_SPLITS[1], 1, 5, 5), jnp.float32) * 0.1
    raw['g2'] = 1.0 + 0.1 * jax.random.normal(ks[7], (EXP_CH,), jnp.float32)
    raw['b2'] = 0.1 * jax.random.normal(ks[8], (EXP_CH,), jnp.float32)
    raw['m2'] = 0.1 * jax.random.normal(ks[9], (EXP_CH,), jnp.float32)
    raw['v2'] = jax.random.uniform(ks[10], (EXP_CH,), jnp.float32, 0.5, 1.5)

    raw['w_p0'] = jax.random.normal(ks[11], (PROJ_OUT_SPLITS[0], PROJ_IN_SPLITS[0], 1, 1),
                                    jnp.float32) * 0.1
    raw['w_p1'] = jax.random.normal(ks[12], (PROJ_OUT_SPLITS[1], PROJ_IN_SPLITS[1], 1, 1),
                                    jnp.float32) * 0.1
    raw['g3'] = 1.0 + 0.1 * jax.random.normal(ks[13], (OUT_CH,), jnp.float32)
    raw['b3'] = 0.1 * jax.random.normal(ks[14], (OUT_CH,), jnp.float32)
    raw['m3'] = 0.1 * jax.random.normal(ks[15], (OUT_CH,), jnp.float32)
    raw['v3'] = jax.random.uniform(ks[16], (OUT_CH,), jnp.float32, 0.5, 1.5)
    return raw


def fold_bn(g, b, m, v):
    scale = g / jnp.sqrt(v + EPS)
    bias = b - m * scale
    return scale, bias


def make_kernel_params(raw, H, W, dw_dtype=jnp.float32):
    """Fold BN (eval mode), pre-cast matmul weights to bf16, and precombine the
    depthwise boundary masks with the BN-folded per-channel tap weights."""
    p = {}
    g3 = DW_SPLITS[0]

    # pointwise expansion, BN scale folded into the (Cexp, Cin) weight; bf16 MXU input.
    s1, b1 = fold_bn(raw['g1'], raw['b1'], raw['m1'], raw['v1'])
    p['w_exp'] = (s1[:, None] * raw['w_exp'][:, :, 0, 0]).astype(jnp.bfloat16)
    p['b1'] = b1[:, None]

    # mixed depthwise: 3x3 group (channels 0:24, padding=1) zero-embedded into the
    # centre of the 5x5 tap grid; 5x5 group (channels 24:48, padding=2) as-is.
    w_taps = jnp.zeros((EXP_CH, 5, 5), jnp.float32)
    w_taps = w_taps.at[:g3, 1:4, 1:4].set(raw['w_dw3'][:, 0])
    w_taps = w_taps.at[g3:, :, :].set(raw['w_dw5'][:, 0])
    s2, b2 = fold_bn(raw['g2'], raw['b2'], raw['m2'], raw['v2'])
    w_taps = s2[:, None, None] * w_taps

    center, outer = _center_outer_taps()
    # Precombined (mask x channel-weight) tensors: single multiply per tap in-kernel.
    p['wm_center'] = jnp.stack(
        [w_taps[:, kh, kw][:, None] * jnp.asarray(_tap_mask(kh, kw, H, W))[None, :]
         for kh, kw in center], axis=0).astype(dw_dtype)            # (9, Cexp, P)
    p['wm_outer'] = jnp.stack(
        [w_taps[g3:, kh, kw][:, None] * jnp.asarray(_tap_mask(kh, kw, H, W))[None, :]
         for kh, kw in outer], axis=0).astype(dw_dtype)             # (16, C5, P)
    p['b2'] = b2[:, None].astype(dw_dtype)

    # grouped 1x1 projection: two small weights (BN scale folded), bf16 MXU inputs.
    s3, b3 = fold_bn(raw['g3'], raw['b3'], raw['m3'], raw['v3'])
    p['w_p0'] = (s3[:PROJ_OUT_SPLITS[0], None] * raw['w_p0'][:, :, 0, 0]).astype(jnp.bfloat16)
    p['w_p1'] = (s3[PROJ_OUT_SPLITS[0]:, None] * raw['w_p1'][:, :, 0, 0]).astype(jnp.bfloat16)
    p['b3'] = b3[:, None]
    return p


def _default_dw_dtype():
    """bf16 depthwise/elementwise math on chips with a bf16 VPU (v6e / v7x);
    f32 on v5e and older (no bf16 VPU -> widen/narrow pairs would erase the win)."""
    try:
        dev = jax.devices()[0]
        if dev.platform != "tpu":
            return jnp.float32
        kind = dev.device_kind.lower()
    except Exception:
        return jnp.float32
    if any(old in kind for old in ("v2", "v3", "v4", "v5")):
        return jnp.float32
    return jnp.bfloat16


# ----------------------------- pure-JAX reference ------------------------------

def _conv(x, w, stride=1, padding=0, groups=1):
    return lax.conv_general_dilated(
        x, w, (stride, stride), [(padding, padding), (padding, padding)],
        dimension_numbers=('NCHW', 'OIHW', 'NCHW'),
        feature_group_count=groups, precision=lax.Precision.HIGHEST)


def _bn(x, g, b, m, v):
    s = g / jnp.sqrt(v + EPS)
    return x * s[None, :, None, None] + (b - m * s)[None, :, None, None]


def reference_forward(x, raw):
    h = jax.nn.relu(_bn(_conv(x, raw['w_exp']),
                        raw['g1'], raw['b1'], raw['m1'], raw['v1']))
    c0 = DW_SPLITS[0]
    d0 = _conv(h[:, :c0], raw['w_dw3'], padding=1, groups=c0)
    d1 = _conv(h[:, c0:], raw['w_dw5'], padding=2, groups=DW_SPLITS[1])
    h = jax.nn.relu(_bn(jnp.concatenate([d0, d1], axis=1),
                        raw['g2'], raw['b2'], raw['m2'], raw['v2']))
    p0 = _conv(h[:, :PROJ_IN_SPLITS[0]], raw['w_p0'])
    p1 = _conv(h[:, PROJ_IN_SPLITS[0]:], raw['w_p1'])
    h = _bn(jnp.concatenate([p0, p1], axis=1),
            raw['g3'], raw['b3'], raw['m3'], raw['v3'])
    return x + h


# ----------------------------- main --------------------------------------------

if __name__ == "__main__":
    key = jax.random.PRNGKey(0)
    key_x, key_p = jax.random.split(key)

    H = W = 16
    x = jax.random.normal(key_x, (2, IN_CH, H, W), jnp.float32)   # NCHW input
    raw = init_raw_params(key_p)

    def run(dw_dtype):
        params = make_kernel_params(raw, H, W, dw_dtype=dw_dtype)
        fwd = jax.jit(mixnet_block_forward)
        return jax.block_until_ready(fwd(x, params))

    dw_dtype = _default_dw_dtype()
    try:
        out = run(dw_dtype)
    except Exception:
        # Safety net: if the bf16 depthwise path fails to lower on this chip,
        # fall back to the f32 path (always supported).
        dw_dtype = jnp.float32
        out = run(dw_dtype)

    ref = jax.block_until_ready(reference_forward(x, raw))

    # Tolerance: bf16-input MXU matmuls (both paths) plus, on v6e/v7x, a fully
    # bf16 depthwise stage, vs. a float32 HIGHEST-precision reference.
    tol = 2e-2 if dw_dtype == jnp.float32 else 3e-2
    np.testing.assert_allclose(np.asarray(out), np.asarray(ref), rtol=tol, atol=tol)
    print("KERNEL_OK")
</pallas_src>

<mosaic_0001>
module attributes {stable_mosaic.version = 11 : i64} {
  func.func @_mixnet_block_kernel(%arg0: i32, %arg1: memref<1x16x256xbf16, #tpu.memory_space<vmem>>, %arg2: memref<48x16xbf16, #tpu.memory_space<vmem>>, %arg3: memref<48x1xf32, #tpu.memory_space<vmem>>, %arg4: memref<9x48x256xf32, #tpu.memory_space<vmem>>, %arg5: memref<16x24x256xf32, #tpu.memory_space<vmem>>, %arg6: memref<48x1xf32, #tpu.memory_space<vmem>>, %arg7: memref<8x24xbf16, #tpu.memory_space<vmem>>, %arg8: memref<8x24xbf16, #tpu.memory_space<vmem>>, %arg9: memref<16x1xf32, #tpu.memory_space<vmem>>, %arg10: memref<1x16x256xf32, #tpu.memory_space<vmem>>) attributes {dimension_semantics = [#tpu.dimension_semantics<parallel>], iteration_bounds = array<i64: 2>, scalar_prefetch = 0 : i64, scratch_operands = 0 : i64, tpu.core_type = #tpu.core_type<tc>, window_params = [{transform_indices = @transform_0, window_bounds = array<i64: 1, 16, 256>}, {pipeline_mode = #tpu.pipeline_mode<synchronous>, transform_indices = @transform_1, window_bounds = array<i64: 48, 16>}, {pipeline_mode = #tpu.pipeline_mode<synchronous>, transform_indices = @transform_2, window_bounds = array<i64: 48, 1>}, {pipeline_mode = #tpu.pipeline_mode<synchronous>, transform_indices = @transform_3, window_bounds = array<i64: 9, 48, 256>}, {pipeline_mode = #tpu.pipeline_mode<synchronous>, transform_indices = @transform_4, window_bounds = array<i64: 16, 24, 256>}, {pipeline_mode = #tpu.pipeline_mode<synchronous>, transform_indices = @transform_5, window_bounds = array<i64: 48, 1>}, {pipeline_mode = #tpu.pipeline_mode<synchronous>, transform_indices = @transform_6, window_bounds = array<i64: 8, 24>}, {pipeline_mode = #tpu.pipeline_mode<synchronous>, transform_indices = @transform_7, window_bounds = array<i64: 8, 24>}, {pipeline_mode = #tpu.pipeline_mode<synchronous>, transform_indices = @transform_8, window_bounds = array<i64: 16, 1>}, {transform_indices = @transform_9, window_bounds = array<i64: 1, 16, 256>}]} {
    %c0 = arith.constant 0 : index
    %c0_0 = arith.constant 0 : index
    %0 = vector.load %arg2[%c0, %c0_0] : memref<48x16xbf16, #tpu.memory_space<vmem>>, vector<48x16xbf16>
    %c0_1 = arith.constant 0 : index
    %c0_2 = arith.constant 0 : index
    %1 = vector.load %arg3[%c0_1, %c0_2] : memref<48x1xf32, #tpu.memory_space<vmem>>, vector<48x1xf32>
    %c0_3 = arith.constant 0 : index
    %c0_4 = arith.constant 0 : index
    %2 = vector.load %arg6[%c0_3, %c0_4] : memref<48x1xf32, #tpu.memory_space<vmem>>, vector<48x1xf32>
    %c0_5 = arith.constant 0 : index
    %c0_6 = arith.constant 0 : index
    %3 = vector.load %arg7[%c0_5, %c0_6] : memref<8x24xbf16, #tpu.memory_space<vmem>>, vector<8x24xbf16>
    %c0_7 = arith.constant 0 : index
    %c0_8 = arith.constant 0 : index
    %4 = vector.load %arg8[%c0_7, %c0_8] : memref<8x24xbf16, #tpu.memory_space<vmem>>, vector<8x24xbf16>
    %c0_9 = arith.constant 0 : index
    %c0_10 = arith.constant 0 : index
    %5 = vector.load %arg9[%c0_9, %c0_10] : memref<16x1xf32, #tpu.memory_space<vmem>>, vector<16x1xf32>
    %c0_11 = arith.constant 0 : index
    %c0_12 = arith.constant 0 : index
    %c0_13 = arith.constant 0 : index
    %6 = vector.load %arg1[%c0_11, %c0_12, %c0_13] : memref<1x16x256xbf16, #tpu.memory_space<vmem>>, vector<1x16x256xbf16>
    %7 = vector.shape_cast %6 : vector<1x16x256xbf16> to vector<16x256xbf16>
    %cst = arith.constant dense<0.000000e+00> : vector<48x256xf32>
    %8 = tpu.matmul %0, %7, %cst {dimension_numbers = #tpu.dot_dimension_numbers<[1], [0], [0], [1], [0, 0, 1, 1], [], []>} : vector<48x16xbf16>, vector<16x256xbf16>, vector<48x256xf32> -> vector<48x256xf32>
    %9 = vector.broadcast %1 : vector<48x1xf32> to vector<48x256xf32>
    %10 = arith.addf %8, %9 : vector<48x256xf32>
    %cst_14 = arith.constant 0.000000e+00 : f32
    %11 = vector.broadcast %cst_14 : f32 to vector<48x256xf32>
    %12 = arith.maximumf %10, %11 : vector<48x256xf32>
    %13 = vector.extract_strided_slice %12 {offsets = [24, 0], sizes = [24, 256], strides = [1, 1]} : vector<48x256xf32> to vector<24x256xf32>
    %c0_15 = arith.constant 0 : index
    %c0_16 = arith.constant 0 : index
    %c0_17 = arith.constant 0 : index
    %14 = vector.load %arg4[%c0_15, %c0_16, %c0_17] : memref<9x48x256xf32, #tpu.memory_space<vmem>>, vector<1x48x256xf32>
    %15 = vector.shape_cast %14 : vector<1x48x256xf32> to vector<48x256xf32>
    %16 = arith.mulf %12, %15 : vector<48x256xf32>
    %17 = vector.shape_cast %2 : vector<48x1xf32> to vector<48x1xf32>
    %18 = vector.broadcast %17 : vector<48x1xf32> to vector<48x256xf32>
    %c17_i32 = arith.constant 17 : i32
    %19 = tpu.dynamic_rotate %12 by %c17_i32 dim 1 : vector<48x256xf32>, i32 -> vector<48x256xf32>
    %c1 = arith.constant 1 : index
    %c0_18 = arith.constant 0 : index
    %c0_19 = arith.constant 0 : index
    %20 = vector.load %arg4[%c1, %c0_18, %c0_19] : memref<9x48x256xf32, #tpu.memory_space<vmem>>, vector<1x48x256xf32>
    %21 = vector.shape_cast %20 : vector<1x48x256xf32> to vector<48x256xf32>
    %22 = arith.mulf %19, %21 : vector<48x256xf32>
    %23 = arith.addf %18, %22 : vector<48x256xf32>
    %c16_i32 = arith.constant 16 : i32
    %24 = tpu.dynamic_rotate %12 by %c16_i32 dim 1 : vector<48x256xf32>, i32 -> vector<48x256xf32>
    %c2 = arith.constant 2 : index
    %c0_20 = arith.constant 0 : index
    %c0_21 = arith.constant 0 : index
    %25 = vector.load %arg4[%c2, %c0_20, %c0_21] : memref<9x48x256xf32, #tpu.memory_space<vmem>>, vector<1x48x256xf32>
    %26 = vector.shape_cast %25 : vector<1x48x256xf32> to vector<48x256xf32>
    %27 = arith.mulf %24, %26 : vector<48x256xf32>
    %28 = arith.addf %16, %27 : vector<48x256xf32>
    %c15_i32 = arith.constant 15 : i32
    %29 = tpu.dynamic_rotate %12 by %c15_i32 dim 1 : vector<48x256xf32>, i32 -> vector<48x256xf32>
    %c3 = arith.constant 3 : index
    %c0_22 = arith.constant 0 : index
    %c0_23 = arith.constant 0 : index
    %30 = vector.load %arg4[%c3, %c0_22, %c0_23] : memref<9x48x256xf32, #tpu.memory_space<vmem>>, vector<1x48x256xf32>
    %31 = vector.shape_cast %30 : vector<1x48x256xf32> to vector<48x256xf32>
    %32 = arith.mulf %29, %31 : vector<48x256xf32>
    %33 = arith.addf %23, %32 : vector<48x256xf32>
    %c1_i32 = arith.constant 1 : i32
    %34 = tpu.dynamic_rotate %12 by %c1_i32 dim 1 : vector<48x256xf32>, i32 -> vector<48x256xf32>
    %c4 = arith.constant 4 : index
    %c0_24 = arith.constant 0 : index
    %c0_25 = arith.constant 0 : index
    %35 = vector.load %arg4[%c4, %c0_24, %c0_25] : memref<9x48x256xf32, #tpu.memory_space<vmem>>, vector<1x48x256xf32>
    %36 = vector.shape_cast %35 : vector<1x48x256xf32> to vector<48x256xf32>
    %37 = arith.mulf %34, %36 : vector<48x256xf32>
    %38 = arith.addf %28, %37 : vector<48x256xf32>
    %c255_i32 = arith.constant 255 : i32
    %39 = tpu.dynamic_rotate %12 by %c255_i32 dim 1 : vector<48x256xf32>, i32 -> vector<48x256xf32>
    %c5 = arith.constant 5 : index
    %c0_26 = arith.constant 0 : index
    %c0_27 = arith.constant 0 : index
    %40 = vector.load %arg4[%c5, %c0_26, %c0_27] : memref<9x48x256xf32, #tpu.memory_space<vmem>>, vector<1x48x256xf32>
    %41 = vector.shape_cast %40 : vector<1x48x256xf32> to vector<48x256xf32>
    %42 = arith.mulf %39, %41 : vector<48x256xf32>
    %43 = arith.addf %33, %42 : vector<48x256xf32>
    %c241_i32 = arith.constant 241 : i32
    %44 = tpu.dynamic_rotate %12 by %c241_i32 dim 1 : vector<48x256xf32>, i32 -> vector<48x256xf32>
    %c6 = arith.constant 6 : index
    %c0_28 = arith.constant 0 : index
    %c0_29 = arith.constant 0 : index
    %45 = vector.load %arg4[%c6, %c0_28, %c0_29] : memref<9x48x256xf32, #tpu.memory_space<vmem>>, vector<1x48x256xf32>
    %46 = vector.shape_cast %45 : vector<1x48x256xf32> to vector<48x256xf32>
    %47 = arith.mulf %44, %46 : vector<48x256xf32>
    %48 = arith.addf %38, %47 : vector<48x256xf32>
    %c240_i32 = arith.constant 240 : i32
    %49 = tpu.dynamic_rotate %12 by %c240_i32 dim 1 : vector<48x256xf32>, i32 -> vector<48x256xf32>
    %c7 = arith.constant 7 : index
    %c0_30 = arith.constant 0 : index
    %c0_31 = arith.constant 0 : index
    %50 = vector.load %arg4[%c7, %c0_30, %c0_31] : memref<9x48x256xf32, #tpu.memory_space<vmem>>, vector<1x48x256xf32>
    %51 = vector.shape_cast %50 : vector<1x48x256xf32> to vector<48x256xf32>
    %52 = arith.mulf %49, %51 : vector<48x256xf32>
    %53 = arith.addf %43, %52 : vector<48x256xf32>
    %c239_i32 = arith.constant 239 : i32
    %54 = tpu.dynamic_rotate %12 by %c239_i32 dim 1 : vector<48x256xf32>, i32 -> vector<48x256xf32>
    %c8 = arith.constant 8 : index
    %c0_32 = arith.constant 0 : index
    %c0_33 = arith.constant 0 : index
    %55 = vector.load %arg4[%c8, %c0_32, %c0_33] : memref<9x48x256xf32, #tpu.memory_space<vmem>>, vector<1x48x256xf32>
    %56 = vector.shape_cast %55 : vector<1x48x256xf32> to vector<48x256xf32>
    %57 = arith.mulf %54, %56 : vector<48x256xf32>
    %58 = arith.addf %48, %57 : vector<48x256xf32>
    %c34_i32 = arith.constant 34 : i32
    %59 = tpu.dynamic_rotate %13 by %c34_i32 dim 1 : vector<24x256xf32>, i32 -> vector<24x256xf32>
    %c0_34 = arith.constant 0 : index
    %c0_35 = arith.constant 0 : index
    %c0_36 = arith.constant 0 : index
    %60 = vector.load %arg5[%c0_34, %c0_35, %c0_36] : memref<16x24x256xf32, #tpu.memory_space<vmem>>, vector<1x24x256xf32>
    %61 = vector.shape_cast %60 : vector<1x24x256xf32> to vector<24x256xf32>
    %62 = arith.mulf %59, %61 : vector<24x256xf32>
    %c33_i32 = arith.constant 33 : i32
    %63 = tpu.dynamic_rotate %13 by %c33_i32 dim 1 : vector<24x256xf32>, i32 -> vector<24x256xf32>
    %c1_37 = arith.constant 1 : index
    %c0_38 = arith.constant 0 : index
    %c0_39 = arith.constant 0 : index
    %64 = vector.load %arg5[%c1_37, %c0_38, %c0_39] : memref<16x24x256xf32, #tpu.memory_space<vmem>>, vector<1x24x256xf32>
    %65 = vector.shape_cast %64 : vector<1x24x256xf32> to vector<24x256xf32>
    %66 = arith.mulf %63, %65 : vector<24x256xf32>
    %c32_i32 = arith.constant 32 : i32
    %67 = tpu.dynamic_rotate %13 by %c32_i32 dim 1 : vector<24x256xf32>, i32 -> vector<24x256xf32>
    %c2_40 = arith.constant 2 : index
    %c0_41 = arith.constant 0 : index
    %c0_42 = arith.constant 0 : index
    %68 = vector.load %arg5[%c2_40, %c0_41, %c0_42] : memref<16x24x256xf32, #tpu.memory_space<vmem>>, vector<1x24x256xf32>
    %69 = vector.shape_cast %68 : vector<1x24x256xf32> to vector<24x256xf32>
    %70 = arith.mulf %67, %69 : vector<24x256xf32>
    %71 = arith.addf %62, %70 : vector<24x256xf32>
    %c31_i32 = arith.constant 31 : i32
    %72 = tpu.dynamic_rotate %13 by %c31_i32 dim 1 : vector<24x256xf32>, i32 -> vector<24x256xf32>
    %c3_43 = arith.constant 3 : index
    %c0_44 = arith.constant 0 : index
    %c0_45 = arith.constant 0 : index
    %73 = vector.load %arg5[%c3_43, %c0_44, %c0_45] : memref<16x24x256xf32, #tpu.memory_space<vmem>>, vector<1x24x256xf32>
    %74 = vector.shape_cast %73 : vector<1x24x256xf32> to vector<24x256xf32>
    %75 = arith.mulf %72, %74 : vector<24x256xf32>
    %76 = arith.addf %66, %75 : vector<24x256xf32>
    %c30_i32 = arith.constant 30 : i32
    %77 = tpu.dynamic_rotate %13 by %c30_i32 dim 1 : vector<24x256xf32>, i32 -> vector<24x256xf32>
    %c4_46 = arith.constant 4 : index
    %c0_47 = arith.constant 0 : index
    %c0_48 = arith.constant 0 : index
    %78 = vector.load %arg5[%c4_46, %c0_47, %c0_48] : memref<16x24x256xf32, #tpu.memory_space<vmem>>, vector<1x24x256xf32>
    %79 = vector.shape_cast %78 : vector<1x24x256xf32> to vector<24x256xf32>
    %80 = arith.mulf %77, %79 : vector<24x256xf32>
    %81 = arith.addf %71, %80 : vector<24x256xf32>
    %c18_i32 = arith.constant 18 : i32
    %82 = tpu.dynamic_rotate %13 by %c18_i32 dim 1 : vector<24x256xf32>, i32 -> vector<24x256xf32>
    %c5_49 = arith.constant 5 : index
    %c0_50 = arith.constant 0 : index
    %c0_51 = arith.constant 0 : index
    %83 = vector.load %arg5[%c5_49, %c0_50, %c0_51] : memref<16x24x256xf32, #tpu.memory_space<vmem>>, vector<1x24x256xf32>
    %84 = vector.shape_cast %83 : vector<1x24x256xf32> to vector<24x256xf32>
    %85 = arith.mulf %82, %84 : vector<24x256xf32>
    %86 = arith.addf %76, %85 : vector<24x256xf32>
    %c14_i32 = arith.constant 14 : i32
    %87 = tpu.dynamic_rotate %13 by %c14_i32 dim 1 : vector<24x256xf32>, i32 -> vector<24x256xf32>
    %c6_52 = arith.constant 6 : index
    %c0_53 = arith.constant 0 : index
    %c0_54 = arith.constant 0 : index
    %88 = vector.load %arg5[%c6_52, %c0_53, %c0_54] : memref<16x24x256xf32, #tpu.memory_space<vmem>>, vector<1x24x256xf32>
    %89 = vector.shape_cast %88 : vector<1x24x256xf32> to vector<24x256xf32>
    %90 = arith.mulf %87, %89 : vector<24x256xf32>
    %91 = arith.addf %81, %90 : vector<24x256xf32>
    %c2_i32 = arith.constant 2 : i32
    %92 = tpu.dynamic_rotate %13 by %c2_i32 dim 1 : vector<24x256xf32>, i32 -> vector<24x256xf32>
    %c7_55 = arith.constant 7 : index
    %c0_56 = arith.constant 0 : index
    %c0_57 = arith.constant 0 : index
    %93 = vector.load %arg5[%c7_55, %c0_56, %c0_57] : memref<16x24x256xf32, #tpu.memory_space<vmem>>, vector<1x24x256xf32>
    %94 = vector.shape_cast %93 : vector<1x24x256xf32> to vector<24x256xf32>
    %95 = arith.mulf %92, %94 : vector<24x256xf32>
    %96 = arith.addf %86, %95 : vector<24x256xf32>
    %c254_i32 = arith.constant 254 : i32
    %97 = tpu.dynamic_rotate %13 by %c254_i32 dim 1 : vector<24x256xf32>, i32 -> vector<24x256xf32>
    %c8_58 = arith.constant 8 : index
    %c0_59 = arith.constant 0 : index
    %c0_60 = arith.constant 0 : index
    %98 = vector.load %arg5[%c8_58, %c0_59, %c0_60] : memref<16x24x256xf32, #tpu.memory_space<vmem>>, vector<1x24x256xf32>
    %99 = vector.shape_cast %98 : vector<1x24x256xf32> to vector<24x256xf32>
    %100 = arith.mulf %97, %99 : vector<24x256xf32>
    %101 = arith.addf %91, %100 : vector<24x256xf32>
    %c242_i32 = arith.constant 242 : i32
    %102 = tpu.dynamic_rotate %13 by %c242_i32 dim 1 : vector<24x256xf32>, i32 -> vector<24x256xf32>
    %c9 = arith.constant 9 : index
    %c0_61 = arith.constant 0 : index
    %c0_62 = arith.constant 0 : index
    %103 = vector.load %arg5[%c9, %c0_61, %c0_62] : memref<16x24x256xf32, #tpu.memory_space<vmem>>, vector<1x24x256xf32>
    %104 = vector.shape_cast %103 : vector<1x24x256xf32> to vector<24x256xf32>
    %105 = arith.mulf %102, %104 : vector<24x256xf32>
    %106 = arith.addf %96, %105 : vector<24x256xf32>
    %c238_i32 = arith.constant 238 : i32
    %107 = tpu.dynamic_rotate %13 by %c238_i32 dim 1 : vector<24x256xf32>, i32 -> vector<24x256xf32>
    %c10 = arith.constant 10 : index
    %c0_63 = arith.constant 0 : index
    %c0_64 = arith.constant 0 : index
    %108 = vector.load %arg5[%c10, %c0_63, %c0_64] : memref<16x24x256xf32, #tpu.memory_space<vmem>>, vector<1x24x256xf32>
    %109 = vector.shape_cast %108 : vector<1x24x256xf32> to vector<24x256xf32>
    %110 = arith.mulf %107, %109 : vector<24x256xf32>
    %111 = arith.addf %101, %110 : vector<24x256xf32>
    %c226_i32 = arith.constant 226 : i32
    %112 = tpu.dynamic_rotate %13 by %c226_i32 dim 1 : vector<24x256xf32>, i32 -> vector<24x256xf32>
    %c11 = arith.constant 11 : index
    %c0_65 = arith.constant 0 : index
    %c0_66 = arith.constant 0 : index
    %113 = vector.load %arg5[%c11, %c0_65, %c0_66] : memref<16x24x256xf32, #tpu.memory_space<vmem>>, vector<1x24x256xf32>
    %114 = vector.shape_cast %113 : vector<1x24x256xf32> to vector<24x256xf32>
    %115 = arith.mulf %112, %114 : vector<24x256xf32>
    %116 = arith.addf %106, %115 : vector<24x256xf32>
    %c225_i32 = arith.constant 225 : i32
    %117 = tpu.dynamic_rotate %13 by %c225_i32 dim 1 : vector<24x256xf32>, i32 -> vector<24x256xf32>
    %c12 = arith.constant 12 : index
    %c0_67 = arith.constant 0 : index
    %c0_68 = arith.constant 0 : index
    %118 = vector.load %arg5[%c12, %c0_67, %c0_68] : memref<16x24x256xf32, #tpu.memory_space<vmem>>, vector<1x24x256xf32>
    %119 = vector.shape_cast %118 : vector<1x24x256xf32> to vector<24x256xf32>
    %120 = arith.mulf %117, %119 : vector<24x256xf32>
    %121 = arith.addf %111, %120 : vector<24x256xf32>
    %c224_i32 = arith.constant 224 : i32
    %122 = tpu.dynamic_rotate %13 by %c224_i32 dim 1 : vector<24x256xf32>, i32 -> vector<24x256xf32>
    %c13 = arith.constant 13 : index
    %c0_69 = arith.constant 0 : index
    %c0_70 = arith.constant 0 : index
    %123 = vector.load %arg5[%c13, %c0_69, %c0_70] : memref<16x24x256xf32, #tpu.memory_space<vmem>>, vector<1x24x256xf32>
    %124 = vector.shape_cast %123 : vector<1x24x256xf32> to vector<24x256xf32>
    %125 = arith.mulf %122, %124 : vector<24x256xf32>
    %126 = arith.addf %116, %125 : vector<24x256xf32>
    %c223_i32 = arith.constant 223 : i32
    %127 = tpu.dynamic_rotate %13 by %c223_i32 dim 1 : vector<24x256xf32>, i32 -> vector<24x256xf32>
    %c14 = arith.constant 14 : index
    %c0_71 = arith.constant 0 : index
    %c0_72 = arith.constant 0 : index
    %128 = vector.load %arg5[%c14, %c0_71, %c0_72] : memref<16x24x256xf32, #tpu.memory_space<vmem>>, vector<1x24x256xf32>
    %129 = vector.shape_cast %128 : vector<1x24x256xf32> to vector<24x256xf32>
    %130 = arith.mulf %127, %129 : vector<24x256xf32>
    %131 = arith.addf %121, %130 : vector<24x256xf32>
    %c222_i32 = arith.constant 222 : i32
    %132 = tpu.dynamic_rotate %13 by %c222_i32 dim 1 : vector<24x256xf32>, i32 -> vector<24x256xf32>
    %c15 = arith.constant 15 : index
    %c0_73 = arith.constant 0 : index
    %c0_74 = arith.constant 0 : index
    %133 = vector.load %arg5[%c15, %c0_73, %c0_74] : memref<16x24x256xf32, #tpu.memory_space<vmem>>, vector<1x24x256xf32>
    %134 = vector.shape_cast %133 : vector<1x24x256xf32> to vector<24x256xf32>
    %135 = arith.mulf %132, %134 : vector<24x256xf32>
    %136 = arith.addf %126, %135 : vector<24x256xf32>
    %137 = vector.extract_strided_slice %58 {offsets = [0, 0], sizes = [24, 256], strides = [1, 1]} : vector<48x256xf32> to vector<24x256xf32>
    %138 = vector.extract_strided_slice %53 {offsets = [0, 0], sizes = [24, 256], strides = [1, 1]} : vector<48x256xf32> to vector<24x256xf32>
    %139 = arith.addf %137, %138 : vector<24x256xf32>
    %cst_75 = arith.constant 0.000000e+00 : f32
    %140 = vector.broadcast %cst_75 : f32 to vector<24x256xf32>
    %141 = arith.maximumf %139, %140 : vector<24x256xf32>
    %142 = vector.extract_strided_slice %58 {offsets = [24, 0], sizes = [24, 256], strides = [1, 1]} : vector<48x256xf32> to vector<24x256xf32>
    %143 = vector.extract_strided_slice %53 {offsets = [24, 0], sizes = [24, 256], strides = [1, 1]} : vector<48x256xf32> to vector<24x256xf32>
    %144 = arith.addf %142, %143 : vector<24x256xf32>
    %145 = arith.addf %131, %136 : vector<24x256xf32>
    %146 = arith.addf %144, %145 : vector<24x256xf32>
    %cst_76 = arith.constant 0.000000e+00 : f32
    %147 = vector.broadcast %cst_76 : f32 to vector<24x256xf32>
    %148 = arith.maximumf %146, %147 : vector<24x256xf32>
    %149 = arith.truncf %141 : vector<24x256xf32> to vector<24x256xbf16>
    %cst_77 = arith.constant dense<0.000000e+00> : vector<8x256xf32>
    %150 = tpu.matmul %3, %149, %cst_77 {dimension_numbers = #tpu.dot_dimension_numbers<[1], [0], [0], [1], [0, 0, 1, 1], [], []>} : vector<8x24xbf16>, vector<24x256xbf16>, vector<8x256xf32> -> vector<8x256xf32>
    %151 = arith.truncf %148 : vector<24x256xf32> to vector<24x256xbf16>
    %cst_78 = arith.constant dense<0.000000e+00> : vector<8x256xf32>
    %152 = tpu.matmul %4, %151, %cst_78 {dimension_numbers = #tpu.dot_dimension_numbers<[1], [0], [0], [1], [0, 0, 1, 1], [], []>} : vector<8x24xbf16>, vector<24x256xbf16>, vector<8x256xf32> -> vector<8x256xf32>
    %153 = tpu.concatenate %150, %152 in 0 : vector<8x256xf32>, vector<8x256xf32> -> vector<16x256xf32>
    %154 = vector.broadcast %5 : vector<16x1xf32> to vector<16x256xf32>
    %155 = arith.addf %153, %154 : vector<16x256xf32>
    %156 = arith.extf %7 : vector<16x256xbf16> to vector<16x256xf32>
    %157 = arith.addf %155, %156 : vector<16x256xf32>
    %c0_79 = arith.constant 0 : index
    %c0_80 = arith.constant 0 : index
    %c0_81 = arith.constant 0 : index
    %158 = vector.load %arg10[%c0_79, %c0_80, %c0_81] : memref<1x16x256xf32, #tpu.memory_space<vmem>>, vector<1x16x256xf32>
    %159 = vector.shape_cast %158 : vector<1x16x256xf32> to vector<16x256xf32>
    %160 = vector.shape_cast %157 : vector<16x256xf32> to vector<1x16x256xf32>
    tpu.vector_store %arg10[%c0_79, %c0_80, %c0_81], %160 {strides = array<i32>} : memref<1x16x256xf32, #tpu.memory_space<vmem>>, vector<1x16x256xf32>,
    return
  }
  func.func @transform_0(%arg0: i32) -> (i32, i32, i32) {
    %c0_i32 = arith.constant 0 : i32
    %c0_i32_0 = arith.constant 0 : i32
    %c0_i32_1 = arith.constant 0 : i32
    return %arg0, %c0_i32, %c0_i32_0 : i32, i32, i32
  }
  func.func @transform_1(%arg0: i32) -> (i32, i32) {
    %c0_i32 = arith.constant 0 : i32
    %c0_i32_0 = arith.constant 0 : i32
    %c0_i32_1 = arith.constant 0 : i32
    return %c0_i32, %c0_i32_0 : i32, i32
  }
  func.func @transform_2(%arg0: i32) -> (i32, i32) {
    %c0_i32 = arith.constant 0 : i32
    %c0_i32_0 = arith.constant 0 : i32
    %c0_i32_1 = arith.constant 0 : i32
    return %c0_i32, %c0_i32_0 : i32, i32
  }
  func.func @transform_3(%arg0: i32) -> (i32, i32, i32) {
    %c0_i32 = arith.constant 0 : i32
    %c0_i32_0 = arith.constant 0 : i32
    %c0_i32_1 = arith.constant 0 : i32
    %c0_i32_2 = arith.constant 0 : i32
    return %c0_i32, %c0_i32_0, %c0_i32_1 : i32, i32, i32
  }
  func.func @transform_4(%arg0: i32) -> (i32, i32, i32) {
    %c0_i32 = arith.constant 0 : i32
    %c0_i32_0 = arith.constant 0 : i32
    %c0_i32_1 = arith.constant 0 : i32
    %c0_i32_2 = arith.constant 0 : i32
    return %c0_i32, %c0_i32_0, %c0_i32_1 : i32, i32, i32
  }
  func.func @transform_5(%arg0: i32) -> (i32, i32) {
    %c0_i32 = arith.constant 0 : i32
    %c0_i32_0 = arith.constant 0 : i32
    %c0_i32_1 = arith.constant 0 : i32
    return %c0_i32, %c0_i32_0 : i32, i32
  }
  func.func @transform_6(%arg0: i32) -> (i32, i32) {
    %c0_i32 = arith.constant 0 : i32
    %c0_i32_0 = arith.constant 0 : i32
    %c0_i32_1 = arith.constant 0 : i32
    return %c0_i32, %c0_i32_0 : i32, i32
  }
  func.func @transform_7(%arg0: i32) -> (i32, i32) {
    %c0_i32 = arith.constant 0 : i32
    %c0_i32_0 = arith.constant 0 : i32
    %c0_i32_1 = arith.constant 0 : i32
    return %c0_i32, %c0_i32_0 : i32, i32
  }
  func.func @transform_8(%arg0: i32) -> (i32, i32) {
    %c0_i32 = arith.constant 0 : i32
    %c0_i32_0 = arith.constant 0 : i32
    %c0_i32_1 = arith.constant 0 : i32
    return %c0_i32, %c0_i32_0 : i32, i32
  }
  func.func @transform_9(%arg0: i32) -> (i32, i32, i32) {
    %c0_i32 = arith.constant 0 : i32
    %c0_i32_0 = arith.constant 0 : i32
    %c0_i32_1 = arith.constant 0 : i32
    return %arg0, %c0_i32, %c0_i32_0 : i32, i32, i32
  }
}

</mosaic_0001>

<bundles_post_ra>
// kernel: mixnet_block_forward.1
= control target key start
LH: loop header
LB: loop body
LE: loop exit
PB: predicated region body
PF: predicated region fallthrough
CT: control target
= control target key end

     0   :  { %14 = vsyncpa [#allocation3], 0  ;;  %s2289_s30 = smov 0   ;;  %s4258_s0 = inlined_call_operand.vmem [shape: bf16[2,16,256], index: 0, kind: input, shape index: {}]   ;;  %s4259_s1 = inlined_call_operand.vmem [shape: bf16[48,16], index: 1, kind: input, shape index: {}]   ;;  %s4260_s2 = inlined_call_operand.vmem [shape: f32[48,1], index: 2, kind: input, shape index: {}]   ;;  %s4261_s3 = inlined_call_operand.vmem [shape: f32[9,48,256], index: 3, kind: input, shape index: {}]   ;;  %s4262_s4 = inlined_call_operand.hbm [shape: f32[16,24,256], index: 4, kind: input, shape index: {}]   ;;  %s4263_s5 = inlined_call_operand.vmem [shape: f32[48,1], index: 5, kind: input, shape index: {}]   ;;  %s4264_s6 = inlined_call_operand.vmem [shape: bf16[8,24], index: 6, kind: input, shape index: {}]   ;;  %s4265_s7 = inlined_call_operand.vmem [shape: bf16[8,24], index: 7, kind: input, shape index: {}]   ;;  %s4266_s8 = inlined_call_operand.vmem [shape: f32[16,1], index: 8, kind: input, shape index: {}]   ;;  %s4267_s9 = inlined_call_operand.vmem [shape: f32[2,16,256], index: 9, kind: output, shape index: {}]  }
   0x1 LB: > { %s2295_s10 = sadd.s32 4294967295, %s2209_s30   ;;  %p1997_p0 = scmp.ge.s32.totalorder %s2209_s30, 1  ;;  %s2209_s30 = sphi %s2289_s30, %s20_s30  }
   0x2   : > { %p245_p1 = scmp.lt.s32.totalorder %s2209_s30, 3  ;;  %s2211_s11 = smov [#allocation2]  }
   0x3   : > { %s266_s12 = sshll.u32 %s2211_s11, 4  ;;  %p2126_p3 = scmp.eq.s32.totalorder %s2295_s10, 0  ;;  %s267_s12 = int_to_ptr.vmem [resolvable:$true] %s266_s12 }
   0x4   : > { %p2299_p2 = pnand %p1997_p0, %p245_p1  ;;  %s2184_s14 = scalar_lea.vmem %s267_s12, 12288 }
   0x5   : > { %p2185_p7 = scmp.ne.s32.totalorder %s267_s12, %s2184_s14  ;;  %p2192_p10 = scmp.lt.s32.totalorder %s267_s12, %s267_s12 }
   0x6   : > { %p2122_p4 = pneg %p2299_p2  ;;  %p2193_p11 = scmp.lt.s32.totalorder %s2184_s14, %s2184_s14 }
   0x8   : > { %p2123_p5 = pnand %p2126_p3, %p2122_p4  ;;  %p2194_p12 = por %p2193_p11, %p2192_p10 }
   0xa   : > { %p2175_p6 = pneg %p2123_p5 }
   0xc   : > { %p2187_p8 = pnand %p2185_p7, %p2175_p6 }
   0xe   : > { %p2188_p9 = pneg %p2187_p8 }
  0x10   : > { %p2195_p13 = pnand %p2194_p12, %p2188_p9 }
  0x12   : > { %2198 = shalt.err (!%p2195_p13)
}
  0x13   : > { %s2212_s15 = smov 256   ;;  %s2213_s16 = smov 16  }
  0x14   : > { %2125 = dma.hbm_to_vmem [thread:$0]  (!%p2123_p5), %s4262_s4, 12288, %s267_s12, [#allocation3], %s2212_s15, %s2212_s15, %s2213_s16  }
  0x15   : > { %302 = sbr.rel (%p2299_p2) target bundleno = 952 (0x3b8), region = 56 }
  0x1a   : > { %2204 = dma.done.wait (%p2126_p3), [#allocation3], 12288  }
  0x1b   : > { %2206 = vsyncadd (%p2126_p3), [#allocation3], 4294955008  ;;  %p338_p0 = scmp.lt.s32.totalorder %s2295_s10, 1  ;;  %v4274_v0 = vmov 0   ;;  %v2168_v5 = vld [vmem:[%s4259_s1] sm:$0xff]   ;;  %vm428_vm0 = vcmask 130048  }
  0x1c   : > { %470 = vmatprep.mubr.bf16.mxu0 %v4274_v0  ;;  %2164 = vset.pattern.permute.xlu0 %v4274_v0  ;;  %v355_v6 = vld [vmem:[%s4260_s2] sm:$0xff]  ;;  %v356_v7 = vld [vmem:[%s4260_s2 + $0x8] sm:$0xff]  ;;  %v357_v8 = vld [vmem:[%s4260_s2 + $0x10] sm:$0xff]  ;;  %s2215_s16 = smov 17   ;;  %s2216_s17 = smov 16   ;;  %vm4330_vm9 = vcmask 1043456  }
  0x1d   : > { %s4494_s10 = smov (!%p338_p0, %s2295_s10), 1  ;;  %2165 = vset.pattern.permute.xlu1 %v4274_v0  ;;  %1839 = vmatprep.mubr.bf16.mxu1 %v4274_v0  ;;  %v358_v9 = vld [vmem:[%s4260_s2 + $0x18] sm:$0xff]  ;;  %v359_v10 = vld [vmem:[%s4260_s2 + $0x20] sm:$0xff]  ;;  %v2169_v11 = vld [vmem:[%s4259_s1 + $0x8] sm:$0xff]   ;;  %s2217_s18 = smov 15  }
  0x1e   : > { %s2116_s19 = sshll.u32 %s4494_s10, 4  ;;  %375 = vperm.xlu0 %2164, %v355_v6   ;;  %385 = vperm.xlu1 %2165, %v357_v8   ;;  %v360_v12 = vld [vmem:[%s4260_s2 + $0x28] sm:$0xff]  ;;  %v361_v13 = vld [vmem:[%s4263_s5] sm:$0xff]  ;;  %v363_v15 = vld [vmem:[%s4263_s5 + $0x10] sm:$0xff]  ;;  %s4272_s20 = smov 127  }
  0x1f   : > { %s2329_s22 = scalar_lea.vmem %s4258_s0, %s2116_s19  ;;  %v362_v14 = vld [vmem:[%s4263_s5 + $0x8] sm:$0xff]  ;;  %v2170_v16 = vld [vmem:[%s4259_s1 + $0x10] sm:$0xff]   ;;  %v364_v17 = vld [vmem:[%s4263_s5 + $0x18] sm:$0xff]  ;;  %s2218_s19 = smov 1  }
  0x20   : > { %v371_v1 = vld [vmem:[%s2329_s22] sm:$0xff]  ;;  %v372_v2 = vld [vmem:[%s2329_s22 + $0x8] sm:$0xff]  ;;  %s2220_s21 = smov 113   ;;  %s4270_s23 = smov 112  }
  0x21   : > { %v2010_v3 = vcombine.high %v371_v1, %v372_v2  ;;  %v2009_v4 = vcombine.low %v371_v1, %v372_v2  ;;  %v365_v18 = vld [vmem:[%s4263_s5 + $0x20] sm:$0xff]  ;;  %v366_v19 = vld [vmem:[%s4263_s5 + $0x28] sm:$0xff]  ;;  %s4268_s24 = smov 111   ;;  %s2223_s25 = smov 34  }
  0x22   : > { %380 = vperm.xlu0 %2164, %v356_v7   ;;  %390 = vperm.xlu1 %2165, %v358_v9   ;;  %s2224_s26 = smov 33   ;;  %s2225_s27 = smov 32  }
  0x23   : > { %452 = vmatprep.subr.bf16.mxu0 %v2010_v3  ;;  %s2226_s28 = smov 31   ;;  %s2227_s29 = smov 30  }
  0x24   : > { %453 = vmatpush1.bf16.msra.mxu0 %v2009_v4  ;;  %s2228_s11 = smov 18   ;;  %s2229_s12 = smov 14  }
  0x25   : > { %s2230_s13 = smov 2   ;;  %s2231_s14 = smov 126  }
  0x26   : > { %395 = vperm.xlu0 %2164, %v359_v10   ;;  %400 = vperm.xlu1 %2165, %v360_v12   ;;  %s2232_s15 = smov 114  }
  0x27   : > { %2011 = vmatmul.mubr.msk.bf16.vlgmr.msra.gmra.mxu0 %vm428_vm0, %v2168_v5 }
  0x28   : > { %480 = vmatprep.mubr.bf16.mxu0 %v4274_v0 }
  0x2a   : > { %539 = vperm.xlu0 %2164, %v361_v13   ;;  %544 = vperm.xlu1 %2165, %v362_v14  }
  0x2e   : > { %549 = vperm.xlu0 %2164, %v363_v15   ;;  %554 = vperm.xlu1 %2165, %v364_v17  }
  0x2f   : > { %2012 = vmatmul.mubr.msk.bf16.gmra.mxu0 %vm428_vm0, %v2169_v11 }
  0x30   : > { %490 = vmatprep.mubr.bf16.mxu0 %v4274_v0  ;;  %v518_v0 = vld [vmem:[%s4261_s3 + $0x28] sm:$0xff] }
  0x32   : > { %559 = vperm.xlu0 %2164, %v365_v18   ;;  %564 = vperm.xlu1 %2165, %v366_v19  }
  0x37   : > { %2013 = vmatmul.mubr.msk.bf16.gmra.mxu0 %vm428_vm0, %v2170_v16 }
  0x99   : > { %v376_v20 = vpop.permute.xlu0 %375  ;;  %v386_v35 = vpop.permute.xlu1 %385 }
  0x9d   : > { %v381_v25 = vpop.permute.xlu0 %380  ;;  %v391_v42 = vpop.permute.xlu1 %390 }
  0xa1   : > { %v396_v49 = vpop.permute.xlu0 %395  ;;  %v2495_v52 = vpop.permute.xlu1 %400 }
  0xa5   : > { %v2501_v53 = vpop.permute.xlu0 %539  ;;  %v2507_v54 = vpop.permute.xlu1 %544 }
  0xa9   : > { %v2509_v55 = vpop.permute.xlu0 %549  ;;  %v2515_v56 = vpop.permute.xlu1 %554 }
  0xaa   : > { %4334 = vst [vmem:[#allocation5_spill] sm:$0xff] %v2515_v56 }
  0xad   : > { %v2521_v57 = vpop.permute.xlu0 %559  ;;  %v2527_v60 = vpop.permute.xlu1 %564 }
  0xae   : > { %4335 = vst [vmem:[#allocation6_spill] sm:$0xff] %v2521_v57  ;;  %4336 = vst [vmem:[#allocation7_spill] sm:$0xff] %v2527_v60 }
  0xe7   : > { %v472_v21 = vpop.f32.mrf.mxu0 }
  0xe8   : > { %v473_v22 = vadd.f32 %v472_v21, %v376_v20 }
  0xe9   : > { %v474_v23 = vpop.f32.mrf.mxu0 }
  0xea   : > { %v2383_v24 = vmax.f32 %v473_v22, 0.0  ;;  %v475_v29 = vadd.f32 %v474_v23, %v376_v20 }
  0xeb   : > { %v476_v26 = vpop.f32.mrf.mxu0 }
  0xec   : > { %v477_v27 = vadd.f32 %v476_v26, %v381_v25  ;;  %567 = vrot.lane.b32.xlu0 %v2383_v24, %s2215_s16  ;;  %v2409_v31 = vmax.f32 %v475_v29, 0.0 }
  0xed   : > { %v478_v30 = vpop.f32.mrf.mxu0 }
  0xee   : > { %v2387_v28 = vmax.f32 %v477_v27, 0.0  ;;  %v479_v32 = vadd.f32 %v478_v30, %v381_v25 }
  0xef   : > { %v482_v34 = vpop.f32.mrf.mxu0 }
  0xf0   : > { %569 = vrot.lane.b32.xlu1 %v2387_v28, %s2215_s16  ;;  %643 = vrot.lane.b32.xlu0 %v2383_v24, %s2216_s17  ;;  %v2415_v33 = vmax.f32 %v479_v32, 0.0  ;;  %v483_v36 = vadd.f32 %v482_v34, %v386_v35 }
  0xf1   : > { %v484_v38 = vpop.f32.mrf.mxu0 }
  0xf2   : > { %v2429_v37 = vmax.f32 %v483_v36, 0.0  ;;  %v485_v39 = vadd.f32 %v484_v38, %v386_v35 }
  0xf3   : > { %v486_v41 = vpop.f32.mrf.mxu0 }
  0xf4   : > { %645 = vrot.lane.b32.xlu1 %v2387_v28, %s2216_s17  ;;  %717 = vrot.lane.b32.xlu0 %v2383_v24, %s2217_s18  ;;  %v2439_v40 = vmax.f32 %v485_v39, 0.0  ;;  %v487_v43 = vadd.f32 %v486_v41, %v391_v42 }
  0xf5   : > { %v488_v45 = vpop.f32.mrf.mxu0 }
  0xf6   : > { %v2457_v44 = vmax.f32 %v487_v43, 0.0  ;;  %v489_v46 = vadd.f32 %v488_v45, %v391_v42 }
  0xf7   : > { %v492_v48 = vpop.f32.mrf.mxu0 }
  0xf8   : > { %719 = vrot.lane.b32.xlu1 %v2387_v28, %s2217_s18  ;;  %791 = vrot.lane.b32.xlu0 %v2383_v24, %s2218_s19  ;;  %v2475_v47 = vmax.f32 %v489_v46, 0.0  ;;  %v493_v50 = vadd.f32 %v492_v48, %v396_v49  ;;  %v591_v48 = vlaneseq }
  0xf9   : > { %v494_v58 = vpop.f32.mrf.mxu0 }
  0xfa   : > { %v2493_v51 = vmax.f32 %v493_v50, 0.0  ;;  %v495_v59 = vadd.f32 %v494_v58, %v396_v49 }
  0xfb   : > { %v496_v10 = vpop.f32.mrf.mxu0 }
  0xfc   : > { %793 = vrot.lane.b32.xlu1 %v2387_v28, %s2218_s19  ;;  %865 = vrot.lane.b32.xlu0 %v2383_v24, %s4272_s20  ;;  %v2535_v62 = vmax.f32 %v495_v59, 0.0  ;;  %v497_v11 = vadd.f32 %v496_v10, %v2495_v52  ;;  %v2018_v10 = vld [vmem:[%s4261_s3 + $0x80] sm:$0xff] }
  0xfd   : > { %v498_v38 = vpop.f32.mrf.mxu0 }
  0xfe   : > { %v2586_v14 = vmax.f32 %v497_v11, 0.0  ;;  %v499_v39 = vadd.f32 %v498_v38, %v2495_v52  ;;  %v2677_v52 = vand.u32 127, %v591_v48  ;;  %v2019_v11 = vld [vmem:[%s4261_s3 + $0x88] sm:$0xff]  ;;  %v517_v48 = vld [vmem:[%s4261_s3 + $0x20] sm:$0xff] }
 0x100   : > { %867 = vrot.lane.b32.xlu1 %v2387_v28, %s4272_s20  ;;  %939 = vrot.lane.b32.xlu0 %v2383_v24, %s2220_s21  ;;  %v2663_v43 = vmax.f32 %v499_v39, 0.0  ;;  %vm593_vm1 = vcmp.lt.s32.totalorder %v2677_v52, 17  ;;  %vm667_vm2 = vcmp.lt.s32.totalorder %v2677_v52, 16  ;;  %vm741_vm3 = vcmp.lt.s32.totalorder %v2677_v52, 15 }
 0x101   : > { %vm889_vm4 = vcmp.lt.s32.totalorder %v2677_v52, 127  ;;  %vm963_vm5 = vcmp.lt.s32.totalorder %v2677_v52, 113  ;;  %vm4332_vm6 = vcmp.lt.s32.totalorder %v2677_v52, 112  ;;  %vm815_vm7 = vcmp.lt.s32.totalorder %v2677_v52, 1 }
 0x102   : > { %vm4331_vm8 = vcmp.lt.s32.totalorder %v2677_v52, 111  ;;  %vm1204_vm10 = vcmp.lt.s32.totalorder %v2677_v52, 33  ;;  %vm1236_vm11 = vcmp.lt.s32.totalorder %v2677_v52, 32  ;;  %vm1173_vm12 = vcmp.lt.s32.totalorder %v2677_v52, 34 }
 0x103   : > { %vm1274_vm13 = vcmp.lt.s32.totalorder %v2677_v52, 31  ;;  %vm1312_vm14 = vcmp.lt.s32.totalorder %v2677_v52, 30  ;;  %vm1388_vm15 = vcmp.lt.s32.totalorder %v2677_v52, 14  ;;  %vm1350_vm0 = vcmp.lt.s32.totalorder %v2677_v52, 18 }
 0x104   : > { %941 = vrot.lane.b32.xlu1 %v2387_v28, %s2220_s21  ;;  %579 = vrot.lane.b32.xlu0 %v2409_v31, %s2215_s16 }
 0x108   : > { %581 = vrot.lane.b32.xlu1 %v2415_v33, %s2215_s16  ;;  %655 = vrot.lane.b32.xlu0 %v2409_v31, %s2216_s17 }
 0x10c   : > { %657 = vrot.lane.b32.xlu1 %v2415_v33, %s2216_s17  ;;  %729 = vrot.lane.b32.xlu0 %v2409_v31, %s2217_s18 }
 0x110   : > { %731 = vrot.lane.b32.xlu1 %v2415_v33, %s2217_s18  ;;  %803 = vrot.lane.b32.xlu0 %v2409_v31, %s2218_s19 }
 0x114   : > { %805 = vrot.lane.b32.xlu1 %v2415_v33, %s2218_s19  ;;  %877 = vrot.lane.b32.xlu0 %v2409_v31, %s4272_s20 }
 0x118   : > { %879 = vrot.lane.b32.xlu1 %v2415_v33, %s4272_s20  ;;  %571 = vrot.lane.b32.xlu0 %v2429_v37, %s2215_s16 }
 0x11c   : > { %881 = vrot.lane.b32.xlu1 %v2439_v40, %s4272_s20  ;;  %647 = vrot.lane.b32.xlu0 %v2429_v37, %s2216_s17 }
 0x120   : > { %955 = vrot.lane.b32.xlu1 %v2439_v40, %s2220_s21  ;;  %721 = vrot.lane.b32.xlu0 %v2429_v37, %s2217_s18 }
 0x124   : > { %1029 = vrot.lane.b32.xlu1 %v2439_v40, %s4270_s23  ;;  %795 = vrot.lane.b32.xlu0 %v2429_v37, %s2218_s19 }
 0x128   : > { %1103 = vrot.lane.b32.xlu1 %v2439_v40, %s4268_s24  ;;  %869 = vrot.lane.b32.xlu0 %v2429_v37, %s4272_s20 }
 0x12c   : > { %573 = vrot.lane.b32.xlu1 %v2457_v44, %s2215_s16  ;;  %943 = vrot.lane.b32.xlu0 %v2429_v37, %s2220_s21 }
 0x130   : > { %649 = vrot.lane.b32.xlu1 %v2457_v44, %s2216_s17  ;;  %1017 = vrot.lane.b32.xlu0 %v2429_v37, %s4270_s23 }
 0x134   : > { %723 = vrot.lane.b32.xlu1 %v2457_v44, %s2217_s18  ;;  %1091 = vrot.lane.b32.xlu0 %v2429_v37, %s4268_s24  ;;  %s4376_s24 = smov 111  }
 0x138   : > { %797 = vrot.lane.b32.xlu1 %v2457_v44, %s2218_s19  ;;  %583 = vrot.lane.b32.xlu0 %v2439_v40, %s2215_s16 }
 0x13c   : > { %585 = vrot.lane.b32.xlu1 %v2475_v47, %s2215_s16  ;;  %659 = vrot.lane.b32.xlu0 %v2439_v40, %s2216_s17 }
 0x140   : > { %661 = vrot.lane.b32.xlu1 %v2475_v47, %s2216_s17  ;;  %733 = vrot.lane.b32.xlu0 %v2439_v40, %s2217_s18 }
 0x144   : > { %735 = vrot.lane.b32.xlu1 %v2475_v47, %s2217_s18  ;;  %807 = vrot.lane.b32.xlu0 %v2439_v40, %s2218_s19 }
 0x148   : > { %809 = vrot.lane.b32.xlu1 %v2475_v47, %s2218_s19  ;;  %1161 = vrot.lane.b32.xlu0 %v2457_v44, %s2223_s25 }
 0x14c   : > { %1163 = vrot.lane.b32.xlu1 %v2493_v51, %s2223_s25  ;;  %1192 = vrot.lane.b32.xlu0 %v2457_v44, %s2224_s26 }
 0x150   : > { %1194 = vrot.lane.b32.xlu1 %v2493_v51, %s2224_s26  ;;  %1224 = vrot.lane.b32.xlu0 %v2457_v44, %s2225_s27 }
 0x154   : > { %1226 = vrot.lane.b32.xlu1 %v2493_v51, %s2225_s27  ;;  %1262 = vrot.lane.b32.xlu0 %v2457_v44, %s2226_s28 }
 0x158   : > { %1264 = vrot.lane.b32.xlu1 %v2493_v51, %s2226_s28  ;;  %1300 = vrot.lane.b32.xlu0 %v2457_v44, %s2227_s29 }
 0x15c   : > { %1302 = vrot.lane.b32.xlu1 %v2493_v51, %s2227_s29  ;;  %1338 = vrot.lane.b32.xlu0 %v2457_v44, %s2228_s11 }
 0x15e   : > { %v2529_v61 = vpop.permute.xlu0 %567 }
 0x160   : > { %1340 = vrot.lane.b32.xlu1 %v2493_v51, %s2228_s11  ;;  %1167 = vrot.lane.b32.xlu0 %v2475_v47, %s2223_s25 }
 0x162   : > { %v2537_v63 = vpop.permute.xlu1 %569  ;;  %v2539_v1 = vpop.permute.xlu0 %643 }
 0x164   : > { %1169 = vrot.lane.b32.xlu1 %v2535_v62, %s2223_s25  ;;  %1198 = vrot.lane.b32.xlu0 %v2475_v47, %s2224_s26 }
 0x166   : > { %v2545_v2 = vpop.permute.xlu1 %645  ;;  %v2547_v3 = vpop.permute.xlu0 %717 }
 0x168   : > { %1200 = vrot.lane.b32.xlu1 %v2535_v62, %s2224_s26  ;;  %1230 = vrot.lane.b32.xlu0 %v2475_v47, %s2225_s27 }
 0x16a   : > { %v2553_v4 = vpop.permute.xlu1 %719  ;;  %v2555_v5 = vpop.permute.xlu0 %791 }
 0x16c   : > { %1232 = vrot.lane.b32.xlu1 %v2535_v62, %s2225_s27  ;;  %1268 = vrot.lane.b32.xlu0 %v2475_v47, %s2226_s28 }
 0x16e   : > { %v2561_v6 = vpop.permute.xlu1 %793  ;;  %v2563_v7 = vpop.permute.xlu0 %865 }
 0x170   : > { %1270 = vrot.lane.b32.xlu1 %v2535_v62, %s2226_s28  ;;  %1306 = vrot.lane.b32.xlu0 %v2475_v47, %s2227_s29 }
 0x172   : > { %v2569_v8 = vpop.permute.xlu1 %867  ;;  %v2571_v9 = vpop.permute.xlu0 %939 }
 0x173   : > { %4337 = vst [vmem:[#allocation8_spill] sm:$0xff] %v2569_v8  ;;  %4338 = vst [vmem:[#allocation9_spill] sm:$0xff] %v2571_v9 }
 0x174   : > { %1308 = vrot.lane.b32.xlu1 %v2535_v62, %s2227_s29  ;;  %1344 = vrot.lane.b32.xlu0 %v2475_v47, %s2228_s11 }
 0x176   : > { %v2578_v12 = vpop.permute.xlu1 %941  ;;  %v2580_v13 = vpop.permute.xlu0 %579 }
 0x177   : > { %4339 = vst [vmem:[#allocation10_spill] sm:$0xff] %v2578_v12 }
 0x178   : > { %1346 = vrot.lane.b32.xlu1 %v2535_v62, %s2228_s11  ;;  %575 = vrot.lane.b32.xlu0 %v2493_v51, %s2215_s16 }
 0x17a   : > { %v2588_v15 = vpop.permute.xlu1 %581  ;;  %v2590_v16 = vpop.permute.xlu0 %655 }
 0x17c   : > { %577 = vrot.lane.b32.xlu1 %v2586_v14, %s2215_s16  ;;  %651 = vrot.lane.b32.xlu0 %v2493_v51, %s2216_s17 }
 0x17e   : > { %v2596_v17 = vpop.permute.xlu1 %657  ;;  %v2598_v18 = vpop.permute.xlu0 %729 }
 0x180   : > { %653 = vrot.lane.b32.xlu1 %v2586_v14, %s2216_s17  ;;  %725 = vrot.lane.b32.xlu0 %v2493_v51, %s2217_s18 }
 0x182   : > { %v2604_v19 = vpop.permute.xlu1 %731  ;;  %v2606_v20 = vpop.permute.xlu0 %803 }
 0x184   : > { %727 = vrot.lane.b32.xlu1 %v2586_v14, %s2217_s18  ;;  %799 = vrot.lane.b32.xlu0 %v2493_v51, %s2218_s19 }
 0x186   : > { %v2612_v21 = vpop.permute.xlu1 %805  ;;  %v2614_v22 = vpop.permute.xlu0 %877 }
 0x188   : > { %801 = vrot.lane.b32.xlu1 %v2586_v14, %s2218_s19  ;;  %587 = vrot.lane.b32.xlu0 %v2535_v62, %s2215_s16 }
 0x18a   : > { %v2620_v23 = vpop.permute.xlu1 %879  ;;  %v572_v25 = vpop.permute.xlu0 %571 }
 0x18b   : > { %4340 = vst [vmem:[#allocation11_spill] sm:$0xff] %v2620_v23 }
 0x18c   : > { %1165 = vrot.lane.b32.xlu1 %v2586_v14, %s2223_s25  ;;  %663 = vrot.lane.b32.xlu0 %v2535_v62, %s2216_s17 }
 0x18e   : > { %v2626_v26 = vpop.permute.xlu1 %881  ;;  %v648_v27 = vpop.permute.xlu0 %647 }
 0x190   : > { %1196 = vrot.lane.b32.xlu1 %v2586_v14, %s2224_s26  ;;  %737 = vrot.lane.b32.xlu0 %v2535_v62, %s2217_s18 }
 0x192   : > { %v2632_v29 = vpop.permute.xlu1 %955  ;;  %v2634_v30 = vpop.permute.xlu0 %721 }
 0x194   : > { %1228 = vrot.lane.b32.xlu1 %v2586_v14, %s2225_s27  ;;  %811 = vrot.lane.b32.xlu0 %v2535_v62, %s2218_s19 }
 0x196   : > { %v2640_v32 = vpop.permute.xlu1 %1029  ;;  %v2642_v34 = vpop.permute.xlu0 %795 }
 0x198   : > { %1266 = vrot.lane.b32.xlu1 %v2586_v14, %s2226_s28  ;;  %1380 = vrot.lane.b32.xlu0 %v2586_v14, %s2229_s12 }
 0x19a   : > { %v2648_v35 = vpop.permute.xlu1 %1103  ;;  %v870_v36 = vpop.permute.xlu0 %869 }
 0x19c   : > { %1304 = vrot.lane.b32.xlu1 %v2586_v14, %s2227_s29  ;;  %1418 = vrot.lane.b32.xlu0 %v2586_v14, %s2230_s13 }
 0x19e   : > { %v2655_v41 = vpop.permute.xlu1 %573  ;;  %v2657_v42 = vpop.permute.xlu0 %943 }
 0x19f   : > { %4341 = vst [vmem:[#allocation12_spill] sm:$0xff] %v2655_v41 }
 0x1a0   : > { %1342 = vrot.lane.b32.xlu1 %v2586_v14, %s2228_s11  ;;  %1456 = vrot.lane.b32.xlu0 %v2586_v14, %s2231_s14 }
 0x1a2   : > { %v2665_v45 = vpop.permute.xlu1 %649  ;;  %v2667_v46 = vpop.permute.xlu0 %1017 }
 0x1a3   : > { %4342 = vst [vmem:[#allocation13_spill] sm:$0xff] %v2665_v45  ;;  %v2030_v45 = vld [vmem:[%s4261_s3 + $0xe0] sm:$0xff] }
 0x1a4   : > { %589 = vrot.lane.b32.xlu1 %v2663_v43, %s2215_s16  ;;  %1494 = vrot.lane.b32.xlu0 %v2586_v14, %s2232_s15  ;;  %s2236_s16 = smov 96  }
 0x1a6   : > { %v2673_v49 = vpop.permute.xlu1 %723  ;;  %v2675_v50 = vpop.permute.xlu0 %1091 }
 0x1a7   : > { %4343 = vst [vmem:[#allocation14_spill] sm:$0xff] %v2673_v49 }
 0x1a8   : > { %665 = vrot.lane.b32.xlu1 %v2663_v43, %s2216_s17  ;;  %1171 = vrot.lane.b32.xlu0 %v2663_v43, %s2223_s25 }
 0x1aa   : > { %v2683_v58 = vpop.permute.xlu1 %797  ;;  %v584_v59 = vpop.permute.xlu0 %583 }
 0x1ab   : > { %4344 = vst [vmem:[#allocation15_spill] sm:$0xff] %v2683_v58  ;;  %v596_v38 = vsel %vm593_vm1, %v572_v25, %v584_v59  ;;  %v602_v39 = vsel %vm593_vm1, %v584_v59, %v572_v25  ;;  %v529_v25 = vmul.f32 %v517_v48, %v2429_v37  ;;  %v530_v59 = vmul.f32 %v518_v0, %v2439_v40  ;;  %v2042_v40 = vld [vmem:[%s4261_s3 + $0x140] sm:$0xff] }
 0x1ac   : > { %739 = vrot.lane.b32.xlu1 %v2663_v43, %s2217_s18  ;;  %1202 = vrot.lane.b32.xlu0 %v2663_v43, %s2224_s26  ;;  %v623_v58 = vmul.f32 %v2018_v10, %v602_v39  ;;  %v624_v49 = vmul.f32 %v2019_v11, %v596_v38  ;;  %v2031_v10 = vld [vmem:[%s4261_s3 + $0xe8] sm:$0xff]  ;;  %v2066_v38 = vld [vmem:[%s4261_s3 + $0x200] sm:$0xff]  ;;  %s2238_s18 = smov 94  }
 0x1ad   : > { %v2043_v11 = vld [vmem:[%s4261_s3 + $0x148] sm:$0xff] }
 0x1ae   : > { %v2706_v57 = vpop.permute.xlu1 %585  ;;  %v660_v56 = vpop.permute.xlu0 %659  ;;  %v2067_v39 = vld [vmem:[%s4261_s3 + $0x208] sm:$0xff]  ;;  %v636_v60 = vadd.f32 %v624_v49, %v2509_v55 }
 0x1af   : > { %4345 = vst [vmem:[#allocation16_spill] sm:$0xff] %v2706_v57  ;;  %v670_v37 = vsel %vm667_vm2, %v648_v27, %v660_v56  ;;  %v676_v0 = vsel %vm667_vm2, %v660_v56, %v648_v27  ;;  %v892_v56 = vsel %vm889_vm4, %v870_v36, %v2626_v26  ;;  %v898_v27 = vsel %vm889_vm4, %v2626_v26, %v870_v36 }
 0x1b0   : > { %813 = vrot.lane.b32.xlu1 %v2663_v43, %s2218_s19  ;;  %1234 = vrot.lane.b32.xlu0 %v2663_v43, %s2225_s27  ;;  %v635_v57 = vadd.f32 %v623_v58, %v2509_v55  ;;  %v697_v26 = vmul.f32 %v2030_v45, %v676_v0  ;;  %v698_v36 = vmul.f32 %v2031_v10, %v670_v37  ;;  %v2054_v55 = vld [vmem:[%s4261_s3 + $0x1a0] sm:$0xff] }
 0x1b1   : > { %v919_v58 = vmul.f32 %v2066_v38, %v892_v56  ;;  %v972_v45 = vsel %vm963_vm5, %v2632_v29, %v2657_v42  ;;  %v2103_v56 = vld [vmem:[%s4261_s3 + $0x328] sm:$0xff] }
 0x1b2   : > { %v2747_v48 = vpop.permute.xlu1 %661  ;;  %v734_v41 = vpop.permute.xlu0 %733 }
 0x1b3   : > { %4346 = vst [vmem:[#allocation17_spill] sm:$0xff] %v2747_v48  ;;  %v744_v12 = vsel %vm741_vm3, %v2634_v30, %v734_v41  ;;  %v750_v9 = vsel %vm741_vm3, %v734_v41, %v2634_v30  ;;  %v920_v48 = vmul.f32 %v2067_v39, %v898_v27  ;;  %v2079_v30 = vld [vmem:[%s4261_s3 + $0x268] sm:$0xff]  ;;  %v966_v41 = vsel %vm963_vm5, %v2657_v42, %v2632_v29 }
 0x1b4   : > { %v771_v8 = vmul.f32 %v2042_v40, %v750_v9  ;;  %v772_v23 = vmul.f32 %v2043_v11, %v744_v12  ;;  %1386 = vrot.lane.b32.xlu1 %v2663_v43, %s2229_s12  ;;  %1272 = vrot.lane.b32.xlu0 %v2663_v43, %s2226_s28  ;;  %v2055_v9 = vld [vmem:[%s4261_s3 + $0x1a8] sm:$0xff]  ;;  %v2078_v12 = vld [vmem:[%s4261_s3 + $0x260] sm:$0xff]  ;;  %v1040_v40 = vsel %vm4332_vm6, %v2667_v46, %v2640_v32 }
 0x1b5   : > { %v1046_v11 = vsel %vm4332_vm6, %v2640_v32, %v2667_v46  ;;  %v710_v29 = vadd.f32 %v698_v36, %v530_v59  ;;  %v993_v46 = vmul.f32 %v2078_v12, %v966_v41  ;;  %v994_v39 = vmul.f32 %v2079_v30, %v972_v45 }
 0x1b6   : > { %v783_v49 = vadd.f32 %v771_v8, %v635_v57  ;;  %v784_v10 = vadd.f32 %v772_v23, %v636_v60  ;;  %v2783_v37 = vpop.permute.xlu1 %735  ;;  %v808_v0 = vpop.permute.xlu0 %807  ;;  %v2090_v60 = vld [vmem:[%s4261_s3 + $0x2c0] sm:$0xff]  ;;  %v2091_v8 = vld [vmem:[%s4261_s3 + $0x2c8] sm:$0xff]  ;;  %v709_v23 = vadd.f32 %v697_v26, %v529_v25  ;;  %v1114_v25 = vsel %vm4331_vm8, %v2675_v50, %v2648_v35 }
 0x1b7   : > { %4347 = vst [vmem:[#allocation18_spill] sm:$0xff] %v2783_v37  ;;  %v818_v38 = vsel %vm815_vm7, %v2642_v34, %v808_v0  ;;  %v824_v57 = vsel %vm815_vm7, %v808_v0, %v2642_v34  ;;  %v2102_v34 = vld [vmem:[%s4261_s3 + $0x320] sm:$0xff]  ;;  %v1120_v59 = vsel %vm4331_vm8, %v2648_v35, %v2675_v50  ;;  %v1067_v30 = vmul.f32 %v2090_v60, %v1040_v40 }
 0x1b8   : > { %v845_v42 = vmul.f32 %v2054_v55, %v824_v57  ;;  %v846_v32 = vmul.f32 %v2055_v9, %v818_v38  ;;  %1424 = vrot.lane.b32.xlu1 %v2663_v43, %s2230_s13  ;;  %1310 = vrot.lane.b32.xlu0 %v2663_v43, %s2227_s29  ;;  %v932_v9 = vadd.f32 %v920_v48, %v784_v10  ;;  %s2233_s29 = smov 110   ;;  %vm1464_vm8 = vcmp.lt.s32.totalorder %v2677_v52, 126 }
 0x1b9   : > { %v931_v12 = vadd.f32 %v919_v58, %v783_v49  ;;  %v1068_v41 = vmul.f32 %v2091_v8, %v1046_v11  ;;  %v1141_v45 = vmul.f32 %v2102_v34, %v1114_v25  ;;  %v1142_v0 = vmul.f32 %v2103_v56, %v1120_v59 }
 0x1ba   : > { %v857_v27 = vadd.f32 %v845_v42, %v709_v23  ;;  %v858_v26 = vadd.f32 %v846_v32, %v710_v29  ;;  %v2823_v36 = vpop.permute.xlu1 %809  ;;  %v2825_v55 = vpop.permute.xlu0 %1161  ;;  %vm1502_vm6 = vcmp.lt.s32.totalorder %v2677_v52, 114 }
 0x1bb   : > { %4348 = vst [vmem:[#allocation19_spill] sm:$0xff] %v2823_v36  ;;  %4349 = vst [vmem:[#allocation20_spill] sm:$0xff] %v2825_v55  ;;  %v1080_v23 = vadd.f32 %v1068_v41, %v932_v9  ;;  %v1079_v48 = vadd.f32 %v1067_v30, %v931_v12 }
 0x1bc   : > { %1462 = vrot.lane.b32.xlu1 %v2663_v43, %s2231_s14  ;;  %v1006_v38 = vadd.f32 %v994_v39, %v858_v26  ;;  %v1005_v35 = vadd.f32 %v993_v46, %v857_v27  ;;  %1348 = vrot.lane.b32.xlu0 %v2663_v43, %s2228_s11  ;;  %s2234_s11 = smov 98  }
 0x1be   : > { %v2831_v50 = vpop.permute.xlu1 %1163  ;;  %v2833_v57 = vpop.permute.xlu0 %1192  ;;  %v1154_v29 = vadd.f32 %v1142_v0, %v1006_v38  ;;  %v1153_v58 = vadd.f32 %v1141_v45, %v1005_v35 }
 0x1bf   : > { %4350 = vst [vmem:[#allocation21_spill] sm:$0xff] %v2831_v50  ;;  %4351 = vst [vmem:[#allocation22_spill] sm:$0xff] %v2833_v57 }
 0x1c0   : > { %1500 = vrot.lane.b32.xlu1 %v2663_v43, %s2232_s15  ;;  %v1761_v49 = vadd.f32 %v1154_v29, %v1080_v23  ;;  %v1760_v10 = vadd.f32 %v1153_v58, %v1079_v48  ;;  %951 = vrot.lane.b32.xlu0 %v2409_v31, %s2220_s21 }
 0x1c2   : > { %v2839_v40 = vpop.permute.xlu1 %1194  ;;  %v2841_v11 = vpop.permute.xlu0 %1224  ;;  %v1767_v60 = vmax.f32 %v1761_v49, 0.0  ;;  %v1766_v8 = vmax.f32 %v1760_v10, 0.0 }
 0x1c3   : > { %4352 = vst [vmem:[#allocation23_spill] sm:$0xff] %v2839_v40  ;;  %4353 = vst [vmem:[#allocation24_spill] sm:$0xff] %v2841_v11  ;;  %v1287_v40 = vld [vmem:[#allocation2 + $0xb8] sm:$0xff] }
 0x1c4   : > { %953 = vrot.lane.b32.xlu1 %v2415_v33, %s2220_s21  ;;  %v1795_v42 = vpack.c.bf16 %v1767_v60, %v1767_v60  ;;  %v1794_v32 = vpack.c.bf16 %v1766_v8, %v1766_v8  ;;  %1376 = vrot.lane.b32.xlu0 %v2457_v44, %s2229_s12 }
 0x1c6   : > { %v2847_v46 = vpop.permute.xlu1 %1226  ;;  %2110 = vmatprep.subr.msk.bf16.mxu1 %vm4330_vm9, %v1795_v42  ;;  %v2850_v39 = vpop.permute.xlu0 %1262  ;;  %v1802_v34 = vsel %vm4330_vm9, %v1794_v32, 0  ;;  %vm1426_vm9 = vcmp.lt.s32.totalorder %v2677_v52, 2 }
 0x1c7   : > { %4354 = vst [vmem:[#allocation25_spill] sm:$0xff] %v2847_v46  ;;  %4355 = vst [vmem:[#allocation26_spill] sm:$0xff] %v2850_v39  ;;  %1820 = vmatpush1.bf16.msra.mxu1 %v1802_v34  ;;  %v1249_v46 = vld [vmem:[#allocation2 + $0x88] sm:$0xff] }
 0x1c8   : > { %1378 = vrot.lane.b32.xlu1 %v2493_v51, %s2229_s12  ;;  %1382 = vrot.lane.b32.xlu0 %v2475_v47, %s2229_s12 }
 0x1ca   : > { %v2857_v56 = vpop.permute.xlu1 %1264  ;;  %v2859_v25 = vpop.permute.xlu0 %1300 }
 0x1cb   : > { %4356 = vst [vmem:[#allocation27_spill] sm:$0xff] %v2857_v56  ;;  %4357 = vst [vmem:[#allocation28_spill] sm:$0xff] %v2859_v25 }
 0x1cc   : > { %1384 = vrot.lane.b32.xlu1 %v2535_v62, %s2229_s12  ;;  %1414 = vrot.lane.b32.xlu0 %v2457_v44, %s2230_s13  ;;  %s4366_s12 = smov 127  }
 0x1ce   : > { %v2865_v59 = vpop.permute.xlu1 %1302  ;;  %v2867_v27 = vpop.permute.xlu0 %1338 }
 0x1cf   : > { %4358 = vst [vmem:[#allocation29_spill] sm:$0xff] %v2865_v59  ;;  %4359 = vst [vmem:[#allocation30_spill] sm:$0xff] %v2867_v27 }
 0x1d0   : > { %1416 = vrot.lane.b32.xlu1 %v2493_v51, %s2230_s13  ;;  %1420 = vrot.lane.b32.xlu0 %v2475_v47, %s2230_s13 }
 0x1d2   : > { %v2873_v26 = vpop.permute.xlu1 %1340  ;;  %v2875_v9 = vpop.permute.xlu0 %1167 }
 0x1d3   : > { %4360 = vst [vmem:[#allocation31_spill] sm:$0xff] %v2873_v26  ;;  %4361 = vst [vmem:[#allocation32_spill] sm:$0xff] %v2875_v9 }
 0x1d4   : > { %1422 = vrot.lane.b32.xlu1 %v2535_v62, %s2230_s13  ;;  %1532 = vrot.lane.b32.xlu0 %v2586_v14, %s2233_s29  ;;  %s4371_s13 = smov 112  }
 0x1d6   : > { %v2881_v12 = vpop.permute.xlu1 %1169  ;;  %v2883_v30 = vpop.permute.xlu0 %1198 }
 0x1d7   : > { %4362 = vst [vmem:[#allocation33_spill] sm:$0xff] %v2881_v12  ;;  %4363 = vst [vmem:[#allocation34_spill] sm:$0xff] %v2883_v30 }
 0x1d8   : > { %1538 = vrot.lane.b32.xlu1 %v2663_v43, %s2233_s29  ;;  %1570 = vrot.lane.b32.xlu0 %v2586_v14, %s2234_s11 }
 0x1da   : > { %v2889_v41 = vpop.permute.xlu1 %1200  ;;  %v2891_v45 = vpop.permute.xlu0 %1230 }
 0x1db   : > { %4364 = vst [vmem:[#allocation35_spill] sm:$0xff] %v2889_v41  ;;  %4365 = vst [vmem:[#allocation36_spill] sm:$0xff] %v2891_v45  ;;  %v1286_v45 = vld [vmem:[#allocation2 + $0xb0] sm:$0xff] }
 0x1dc   : > { %1576 = vrot.lane.b32.xlu1 %v2663_v43, %s2234_s11  ;;  %875 = vrot.lane.b32.xlu0 %v2586_v14, %s4366_s12 }
 0x1de   : > { %v2897_v0 = vpop.permute.xlu1 %1232  ;;  %v2899_v38 = vpop.permute.xlu0 %1268 }
 0x1df   : > { %4367 = vst [vmem:[#allocation37_spill] sm:$0xff] %v2897_v0  ;;  %4368 = vst [vmem:[#allocation38_spill] sm:$0xff] %v2899_v38  ;;  %v1217_v38 = vld [vmem:[#allocation2 + $0x58] sm:$0xff]  ;;  %v1248_v0 = vld [vmem:[#allocation2 + $0x80] sm:$0xff] }
 0x1e0   : > { %887 = vrot.lane.b32.xlu1 %v2663_v43, %s4366_s12  ;;  %949 = vrot.lane.b32.xlu0 %v2586_v14, %s2220_s21 }
 0x1e2   : > { %v2905_v35 = vpop.permute.xlu1 %1270  ;;  %v2907_v23 = vpop.permute.xlu0 %1306 }
 0x1e3   : > { %4369 = vst [vmem:[#allocation39_spill] sm:$0xff] %v2905_v35  ;;  %4370 = vst [vmem:[#allocation40_spill] sm:$0xff] %v2907_v23  ;;  %v1216_v23 = vld [vmem:[#allocation2 + $0x50] sm:$0xff] }
 0x1e4   : > { %961 = vrot.lane.b32.xlu1 %v2663_v43, %s2220_s21  ;;  %1013 = vrot.lane.b32.xlu0 %v2383_v24, %s4371_s13 }
 0x1e6   : > { %v2913_v29 = vpop.permute.xlu1 %1308  ;;  %v2915_v48 = vpop.permute.xlu0 %1344 }
 0x1e7   : > { %4372 = vst [vmem:[#allocation41_spill] sm:$0xff] %v2913_v29  ;;  %4373 = vst [vmem:[#allocation42_spill] sm:$0xff] %v2915_v48 }
 0x1e8   : > { %1015 = vrot.lane.b32.xlu1 %v2387_v28, %s4371_s13  ;;  %1025 = vrot.lane.b32.xlu0 %v2409_v31, %s4371_s13 }
 0x1ea   : > { %v2921_v58 = vpop.permute.xlu1 %1346  ;;  %v2923_v49 = vpop.permute.xlu0 %575 }
 0x1eb   : > { %4374 = vst [vmem:[#allocation43_spill] sm:$0xff] %v2921_v58  ;;  %4375 = vst [vmem:[#allocation44_spill] sm:$0xff] %v2923_v49 }
 0x1ec   : > { %1027 = vrot.lane.b32.xlu1 %v2415_v33, %s4371_s13  ;;  %1087 = vrot.lane.b32.xlu0 %v2383_v24, %s4376_s24 }
 0x1ee   : > { %v2929_v10 = vpop.permute.xlu1 %577  ;;  %v2931_v60 = vpop.permute.xlu0 %651 }
 0x1ef   : > { %4377 = vst [vmem:[#allocation45_spill] sm:$0xff] %v2929_v10  ;;  %4378 = vst [vmem:[#allocation46_spill] sm:$0xff] %v2931_v60 }
 0x1f0   : > { %1089 = vrot.lane.b32.xlu1 %v2387_v28, %s4376_s24  ;;  %1099 = vrot.lane.b32.xlu0 %v2409_v31, %s4376_s24 }
 0x1f2   : > { %v2937_v8 = vpop.permute.xlu1 %653  ;;  %v2939_v42 = vpop.permute.xlu0 %725 }
 0x1f3   : > { %4379 = vst [vmem:[#allocation47_spill] sm:$0xff] %v2937_v8  ;;  %4380 = vst [vmem:[#allocation48_spill] sm:$0xff] %v2939_v42 }
 0x1f4   : > { %1101 = vrot.lane.b32.xlu1 %v2415_v33, %s4376_s24  ;;  %1452 = vrot.lane.b32.xlu0 %v2457_v44, %s2231_s14 }
 0x1f6   : > { %v2945_v32 = vpop.permute.xlu1 %727  ;;  %v2947_v34 = vpop.permute.xlu0 %799 }
 0x1f7   : > { %4381 = vst [vmem:[#allocation49_spill] sm:$0xff] %v2945_v32  ;;  %4382 = vst [vmem:[#allocation50_spill] sm:$0xff] %v2947_v34 }
 0x1f8   : > { %1454 = vrot.lane.b32.xlu1 %v2493_v51, %s2231_s14  ;;  %1458 = vrot.lane.b32.xlu0 %v2475_v47, %s2231_s14 }
 0x1fa   : > { %v2953_v60 = vpop.permute.xlu1 %801  ;;  %v2955_v49 = vpop.permute.xlu0 %587 }
 0x1fb   : > { %4383 = vst [vmem:[#allocation51_spill] sm:$0xff] %v2953_v60  ;;  %4384 = vst [vmem:[#allocation52_spill] sm:$0xff] %v2955_v49 }
 0x1fc   : > { %1460 = vrot.lane.b32.xlu1 %v2535_v62, %s2231_s14  ;;  %1490 = vrot.lane.b32.xlu0 %v2457_v44, %s2232_s15  ;;  %s2235_s14 = smov 97  }
 0x1fe   : > { %v2961_v42 = vpop.permute.xlu1 %1165  ;;  %v2963_v36 = vpop.permute.xlu0 %663 }
 0x1ff   : > { %4385 = vst [vmem:[#allocation53_spill] sm:$0xff] %v2963_v36 }
 0x200   : > { %1492 = vrot.lane.b32.xlu1 %v2493_v51, %s2232_s15  ;;  %1496 = vrot.lane.b32.xlu0 %v2475_v47, %s2232_s15 }
 0x202   : > { %v1197_v34 = vpop.permute.xlu1 %1196  ;;  %v2969_v37 = vpop.permute.xlu0 %737 }
 0x203   : > { %4386 = vst [vmem:[#allocation54_spill] sm:$0xff] %v2969_v37 }
 0x204   : > { %1498 = vrot.lane.b32.xlu1 %v2535_v62, %s2232_s15  ;;  %1608 = vrot.lane.b32.xlu0 %v2586_v14, %s2235_s14  ;;  %s2237_s15 = smov 95  }
 0x206   : > { %v1229_v49 = vpop.permute.xlu1 %1228  ;;  %v2975_v32 = vpop.permute.xlu0 %811 }
 0x207   : > { %4387 = vst [vmem:[#allocation55_spill] sm:$0xff] %v2975_v32 }
 0x208   : > { %1614 = vrot.lane.b32.xlu1 %v2663_v43, %s2235_s14  ;;  %1646 = vrot.lane.b32.xlu0 %v2586_v14, %s2236_s16 }
 0x20a   : > { %v1267_v36 = vpop.permute.xlu1 %1266  ;;  %v2981_v10 = vpop.permute.xlu0 %1380 }
 0x20c   : > { %1652 = vrot.lane.b32.xlu1 %v2663_v43, %s2236_s16  ;;  %1023 = vrot.lane.b32.xlu0 %v2586_v14, %s4371_s13 }
 0x20e   : > { %v2987_v37 = vpop.permute.xlu1 %1304  ;;  %v2989_v26 = vpop.permute.xlu0 %1418 }
 0x210   : > { %1035 = vrot.lane.b32.xlu1 %v2663_v43, %s4371_s13  ;;  %1097 = vrot.lane.b32.xlu0 %v2586_v14, %s4376_s24 }
 0x212   : > { %v2995_v32 = vpop.permute.xlu1 %1342  ;;  %v2997_v58 = vpop.permute.xlu0 %1456 }
 0x214   : > { %1109 = vrot.lane.b32.xlu1 %v2663_v43, %s4376_s24  ;;  %1528 = vrot.lane.b32.xlu0 %v2457_v44, %s2233_s29 }
 0x216   : > { %v3003_v27 = vpop.permute.xlu1 %589  ;;  %v3005_v48 = vpop.permute.xlu0 %1494 }
 0x217   : > { %4388 = vst [vmem:[#allocation56_spill] sm:$0xff] %v3003_v27 }
 0x218   : > { %1530 = vrot.lane.b32.xlu1 %v2493_v51, %s2233_s29  ;;  %1534 = vrot.lane.b32.xlu0 %v2475_v47, %s2233_s29 }
 0x21a   : > { %v3011_v56 = vpop.permute.xlu1 %665  ;;  %v1172_v35 = vpop.permute.xlu0 %1171 }
 0x21b   : > { %4389 = vst [vmem:[#allocation57_spill] sm:$0xff] %v3011_v56  ;;  %v1176_v41 = vsel %vm1173_vm12, %v2961_v42, %v1172_v35  ;;  %v1179_v8 = vsel %vm1173_vm12, %v1172_v35, %v2961_v42  ;;  %v1324_v35 = vld [vmem:[#allocation2 + $0xe0] sm:$0xff] }
 0x21c   : > { %1536 = vrot.lane.b32.xlu1 %v2535_v62, %s2233_s29  ;;  %1566 = vrot.lane.b32.xlu0 %v2457_v44, %s2234_s11 }
 0x21e   : > { %v3017_v59 = vpop.permute.xlu1 %739  ;;  %v1203_v27 = vpop.permute.xlu0 %1202 }
 0x21f   : > { %4390 = vst [vmem:[#allocation58_spill] sm:$0xff] %v3017_v59  ;;  %v1207_v59 = vsel %vm1204_vm10, %v1197_v34, %v1203_v27  ;;  %v1210_v39 = vsel %vm1204_vm10, %v1203_v27, %v1197_v34  ;;  %v1184_v27 = vld [vmem:[#allocation2 + $0x20] sm:$0xff]  ;;  %v1185_v34 = vld [vmem:[#allocation2 + $0x28] sm:$0xff] }
 0x220   : > { %1568 = vrot.lane.b32.xlu1 %v2493_v51, %s2234_s11  ;;  %1572 = vrot.lane.b32.xlu0 %v2475_v47, %s2234_s11  ;;  %v1222_v57 = vmul.f32 %v1216_v23, %v1210_v39  ;;  %v1190_v39 = vmul.f32 %v1184_v27, %v1179_v8  ;;  %v1401_v23 = vld [vmem:[#allocation2 + $0x148] sm:$0xff] }
 0x222   : > { %v3023_v29 = vpop.permute.xlu1 %813  ;;  %v1235_v25 = vpop.permute.xlu0 %1234 }
 0x223   : > { %4391 = vst [vmem:[#allocation59_spill] sm:$0xff] %v3023_v29  ;;  %v1239_v60 = vsel %vm1236_vm11, %v1229_v49, %v1235_v25  ;;  %v1242_v29 = vsel %vm1236_vm11, %v1235_v25, %v1229_v49  ;;  %v1223_v25 = vmul.f32 %v1217_v38, %v1207_v59  ;;  %v1191_v59 = vmul.f32 %v1185_v34, %v1176_v41 }
 0x224   : > { %1574 = vrot.lane.b32.xlu1 %v2535_v62, %s2234_s11  ;;  %1684 = vrot.lane.b32.xlu0 %v2586_v14, %s2237_s15  ;;  %v1254_v12 = vmul.f32 %v1248_v0, %v1242_v29  ;;  %v1255_v50 = vmul.f32 %v1249_v46, %v1239_v60 }
 0x226   : > { %v1387_v11 = vpop.permute.xlu1 %1386  ;;  %v1273_v56 = vpop.permute.xlu0 %1272  ;;  %v1260_v60 = vadd.f32 %v1254_v12, %v1190_v39  ;;  %v1362_v12 = vld [vmem:[#allocation2 + $0x110] sm:$0xff] }
 0x227   : > { %v1277_v49 = vsel %vm1274_vm13, %v1267_v36, %v1273_v56  ;;  %v1280_v30 = vsel %vm1274_vm13, %v1273_v56, %v1267_v36  ;;  %v1325_v36 = vld [vmem:[#allocation2 + $0xe8] sm:$0xff]  ;;  %v1400_v56 = vld [vmem:[#allocation2 + $0x140] sm:$0xff]  ;;  %v1391_v46 = vsel %vm1388_vm15, %v2981_v10, %v1387_v11 }
 0x228   : > { %1690 = vrot.lane.b32.xlu1 %v2663_v43, %s2237_s15  ;;  %v1292_v55 = vmul.f32 %v1286_v45, %v1280_v30  ;;  %v1293_v9 = vmul.f32 %v1287_v40, %v1277_v49  ;;  %1722 = vrot.lane.b32.xlu0 %v2586_v14, %s2238_s18  ;;  %v1394_v40 = vsel %vm1388_vm15, %v1387_v11, %v2981_v10  ;;  %v1477_v10 = vld [vmem:[#allocation2 + $0x1a8] sm:$0xff]  ;;  %v1439_v49 = vld [vmem:[#allocation2 + $0x178] sm:$0xff] }
 0x229   : > { %v1261_v11 = vadd.f32 %v1255_v50, %v1191_v59  ;;  %v1406_v8 = vmul.f32 %v1400_v56, %v1394_v40  ;;  %v1407_v42 = vmul.f32 %v1401_v23, %v1391_v46  ;;  %v1363_v50 = vld [vmem:[#allocation2 + $0x118] sm:$0xff] }
 0x22a   : > { %v1425_v38 = vpop.permute.xlu1 %1424  ;;  %v1298_v30 = vadd.f32 %v1292_v55, %v1222_v57  ;;  %v1299_v45 = vadd.f32 %v1293_v9, %v1223_v25  ;;  %v1311_v0 = vpop.permute.xlu0 %1310  ;;  %v1476_v9 = vld [vmem:[#allocation2 + $0x1a0] sm:$0xff]  ;;  %v1438_v25 = vld [vmem:[#allocation2 + $0x170] sm:$0xff] }
 0x22b   : > { %v1315_v41 = vsel %vm1312_vm14, %v2987_v37, %v1311_v0  ;;  %v1318_v29 = vsel %vm1312_vm14, %v1311_v0, %v2987_v37  ;;  %v1429_v37 = vsel %vm1426_vm9, %v2989_v26, %v1425_v38  ;;  %v1432_v27 = vsel %vm1426_vm9, %v1425_v38, %v2989_v26 }
 0x22c   : > { %1728 = vrot.lane.b32.xlu1 %v2663_v43, %s2238_s18  ;;  %v1330_v55 = vmul.f32 %v1324_v35, %v1318_v29  ;;  %v1331_v57 = vmul.f32 %v1325_v36, %v1315_v41  ;;  %871 = vrot.lane.b32.xlu0 %v2457_v44, %s4366_s12 }
 0x22e   : > { %v1463_v34 = vpop.permute.xlu1 %1462  ;;  %v1336_v39 = vadd.f32 %v1330_v55, %v1260_v60  ;;  %v1337_v59 = vadd.f32 %v1331_v57, %v1261_v11  ;;  %v1349_v56 = vpop.permute.xlu0 %1348  ;;  %v1445_v60 = vmul.f32 %v1439_v49, %v1429_v37  ;;  %v1514_v11 = vld [vmem:[#allocation2 + $0x1d0] sm:$0xff]  ;;  %v1515_v55 = vld [vmem:[#allocation2 + $0x1d8] sm:$0xff] }
 0x22f   : > { %v1467_v35 = vsel %vm1464_vm8, %v2997_v58, %v1463_v34  ;;  %v1470_v36 = vsel %vm1464_vm8, %v1463_v34, %v2997_v58  ;;  %v1353_v26 = vsel %vm1350_vm0, %v2995_v32, %v1349_v56  ;;  %v1356_v38 = vsel %vm1350_vm0, %v1349_v56, %v2995_v32 }
 0x230   : > { %v1482_v23 = vmul.f32 %v1476_v9, %v1467_v35  ;;  %v1483_v46 = vmul.f32 %v1477_v10, %v1470_v36  ;;  %873 = vrot.lane.b32.xlu1 %v2493_v51, %s4366_s12  ;;  %v1412_v40 = vadd.f32 %v1406_v8, %v1336_v39  ;;  %v1413_v0 = vadd.f32 %v1407_v42, %v1337_v59  ;;  %v513_v39 = vld [vmem:[%s4261_s3] sm:$0xff]  ;;  %v514_v59 = vld [vmem:[%s4261_s3 + $0x8] sm:$0xff]  ;;  %v515_v36 = vld [vmem:[%s4261_s3 + $0x10] sm:$0xff] }
 0x231   : > { %v1368_v41 = vmul.f32 %v1362_v12, %v1356_v38  ;;  %v1369_v29 = vmul.f32 %v1363_v50, %v1353_v26  ;;  %883 = vrot.lane.b32.xlu0 %v2475_v47, %s4366_s12  ;;  %v1444_v58 = vmul.f32 %v1438_v25, %v1432_v27  ;;  %v600_v25 = vsel %vm593_vm1, %v2580_v13, %v2529_v61 }
 0x232   : > { %v1501_v57 = vpop.permute.xlu1 %1500  ;;  %v3099_v9 = vadd.f32 %v1482_v23, %v1412_v40  ;;  %v3101_v10 = vadd.f32 %v1483_v46, %v1413_v0  ;;  %v3103_v35 = vpop.permute.xlu0 %951  ;;  %v595_v26 = vsel %vm593_vm1, %v2537_v63, %v2588_v15  ;;  %v601_v38 = vsel %vm593_vm1, %v2588_v15, %v2537_v63  ;;  %v516_v40 = vld [vmem:[%s4261_s3 + $0x18] sm:$0xff] }
 0x233   : > { %v1374_v32 = vadd.f32 %v1368_v41, %v1298_v30  ;;  %v1375_v34 = vadd.f32 %v1369_v29, %v1299_v45  ;;  %v1505_v8 = vsel %vm1502_vm6, %v3005_v48, %v1501_v57  ;;  %v1508_v42 = vsel %vm1502_vm6, %v1501_v57, %v3005_v48  ;;  %v2014_v30 = vld [vmem:[%s4261_s3 + $0x60] sm:$0xff]  ;;  %v2015_v45 = vld [vmem:[%s4261_s3 + $0x68] sm:$0xff]  ;;  %v523_v57 = vld [vmem:[%s4261_s3 + $0x50] sm:$0xff] }
 0x234   : > { %885 = vrot.lane.b32.xlu1 %v2535_v62, %s4366_s12  ;;  %v1520_v12 = vmul.f32 %v1514_v11, %v1505_v8  ;;  %v1521_v50 = vmul.f32 %v1515_v55, %v1508_v42  ;;  %v594_v48 = vsel %vm593_vm1, %v2529_v61, %v2580_v13  ;;  %v2016_v61 = vld [vmem:[%s4261_s3 + $0x70] sm:$0xff]  ;;  %v2017_v13 = vld [vmem:[%s4261_s3 + $0x78] sm:$0xff]  ;;  %v619_v0 = vmul.f32 %v2014_v30, %v600_v25  ;;  %v2026_v29 = vld [vmem:[%s4261_s3 + $0xc0] sm:$0xff] }
 0x235   : > { %v1450_v37 = vadd.f32 %v1444_v58, %v1374_v32  ;;  %v1451_v27 = vadd.f32 %v1445_v60, %v1375_v34  ;;  %945 = vrot.lane.b32.xlu0 %v2457_v44, %s2220_s21  ;;  %v620_v41 = vmul.f32 %v2015_v45, %v594_v48  ;;  %v2027_v58 = vld [vmem:[%s4261_s3 + $0xc8] sm:$0xff]  ;;  %v668_v63 = vsel %vm667_vm2, %v2539_v1, %v2590_v16  ;;  %v524_v32 = vld [vmem:[%s4261_s3 + $0x58] sm:$0xff] }
 0x236   : > { %v3129_v49 = vpop.permute.xlu1 %953  ;;  %v1377_v46 = vpop.permute.xlu0 %1376  ;;  %v674_v15 = vsel %vm667_vm2, %v2590_v16, %v2539_v1  ;;  %v526_v60 = vmul.f32 %v514_v59, %v2409_v31  ;;  %v525_v11 = vmul.f32 %v513_v39, %v2383_v24  ;;  %v527_v55 = vmul.f32 %v515_v36, %v2387_v28  ;;  %v2028_v24 = vld [vmem:[%s4261_s3 + $0xd0] sm:$0xff]  ;;  %v2029_v48 = vld [vmem:[%s4261_s3 + $0xd8] sm:$0xff] }
 0x237   : > { %v3140_v56 = vadd.f32 %v1520_v12, %v1450_v37  ;;  %v3142_v23 = vadd.f32 %v1521_v50, %v1451_v27  ;;  %v621_v8 = vmul.f32 %v2016_v61, %v601_v38  ;;  %v622_v1 = vmul.f32 %v2017_v13, %v595_v26 }
 0x238   : > { %947 = vrot.lane.b32.xlu1 %v2493_v51, %s2220_s21  ;;  %v3189_v16 = vmul.f32 %v516_v40, %v2415_v33  ;;  %v675_v28 = vsel %vm667_vm2, %v2596_v17, %v2545_v2  ;;  %v693_v42 = vmul.f32 %v2026_v29, %v674_v15  ;;  %v694_v37 = vmul.f32 %v2027_v58, %v668_v63  ;;  %v2050_v58 = vld [vmem:[%s4261_s3 + $0x180] sm:$0xff] }
 0x239   : > { %957 = vrot.lane.b32.xlu0 %v2475_v47, %s2220_s21  ;;  %v631_v12 = vadd.f32 %v619_v0, %v2501_v53  ;;  %v632_v50 = vadd.f32 %v620_v41, %v2501_v53  ;;  %v3211_v30 = vmul.f32 %v523_v57, %v2586_v14  ;;  %v3214_v45 = vmul.f32 %v524_v32, %v2663_v43  ;;  %v2038_v53 = vld [vmem:[%s4261_s3 + $0x120] sm:$0xff]  ;;  %v2039_v14 = vld [vmem:[%s4261_s3 + $0x128] sm:$0xff] }
 0x23a   : > { %v1379_v34 = vpop.permute.xlu1 %1378  ;;  %v1383_v31 = vpop.permute.xlu0 %1382  ;;  %v669_v25 = vsel %vm667_vm2, %v2545_v2, %v2596_v17  ;;  %v695_v39 = vmul.f32 %v2028_v24, %v675_v28  ;;  %v742_v43 = vsel %vm741_vm3, %v2547_v3, %v2598_v18  ;;  %v748_v59 = vsel %vm741_vm3, %v2598_v18, %v2547_v3  ;;  %v2040_v3 = vld [vmem:[%s4261_s3 + $0x130] sm:$0xff]  ;;  %v2041_v18 = vld [vmem:[%s4261_s3 + $0x138] sm:$0xff] }
 0x23b   : > { %v3200_v27 = vsel %vm1388_vm15, %v1377_v46, %v1383_v31  ;;  %v3204_v33 = vsel %vm1388_vm15, %v1383_v31, %v1377_v46  ;;  %v633_v17 = vadd.f32 %v621_v8, %v2507_v54  ;;  %v634_v36 = vadd.f32 %v622_v1, %v2507_v54  ;;  %v2063_v8 = vld [vmem:[%s4261_s3 + $0x1e8] sm:$0xff]  ;;  %v2064_v28 = vld [vmem:[%s4261_s3 + $0x1f0] sm:$0xff] }
 0x23c   : > { %959 = vrot.lane.b32.xlu1 %v2535_v62, %s2220_s21  ;;  %v705_v26 = vadd.f32 %v693_v42, %v525_v11  ;;  %v706_v38 = vadd.f32 %v694_v37, %v526_v60  ;;  %v743_v54 = vsel %vm741_vm3, %v2553_v4, %v2604_v19  ;;  %v749_v40 = vsel %vm741_vm3, %v2604_v19, %v2553_v4  ;;  %v2051_v4 = vld [vmem:[%s4261_s3 + $0x188] sm:$0xff]  ;;  %v2052_v60 = vld [vmem:[%s4261_s3 + $0x190] sm:$0xff]  ;;  %v2053_v11 = vld [vmem:[%s4261_s3 + $0x198] sm:$0xff] }
 0x23d   : > { %1604 = vrot.lane.b32.xlu0 %v2457_v44, %s2235_s14  ;;  %v696_v0 = vmul.f32 %v2029_v48, %v669_v25  ;;  %v767_v41 = vmul.f32 %v2038_v53, %v748_v59  ;;  %v768_v29 = vmul.f32 %v2039_v14, %v742_v43  ;;  %v822_v63 = vsel %vm815_vm7, %v2606_v20, %v2555_v5  ;;  %v4392_v31 = vld [vmem:[#allocation11_spill] sm:$0xff]  ;;  %v4393_v42 = vld [vmem:[#allocation8_spill] sm:$0xff] }
 0x23e   : > { %v1385_v2 = vpop.permute.xlu1 %1384  ;;  %v1415_v13 = vpop.permute.xlu0 %1414  ;;  %v707_v15 = vadd.f32 %v695_v39, %v527_v55  ;;  %v816_v19 = vsel %vm815_vm7, %v2555_v5, %v2606_v20  ;;  %v817_v55 = vsel %vm815_vm7, %v2561_v6, %v2612_v21  ;;  %v823_v57 = vsel %vm815_vm7, %v2612_v21, %v2561_v6  ;;  %v2065_v53 = vld [vmem:[%s4261_s3 + $0x1f8] sm:$0xff] }
 0x23f   : > { %v3243_v46 = vsel %vm1388_vm15, %v1379_v34, %v1385_v2  ;;  %v3247_v61 = vsel %vm1388_vm15, %v1385_v2, %v1379_v34  ;;  %v769_v5 = vmul.f32 %v2040_v3, %v749_v40  ;;  %v770_v20 = vmul.f32 %v2041_v18, %v743_v54  ;;  %v2062_v34 = vld [vmem:[%s4261_s3 + $0x1e0] sm:$0xff] }
 0x240   : > { %1606 = vrot.lane.b32.xlu1 %v2493_v51, %s2235_s14  ;;  %v890_v1 = vsel %vm889_vm4, %v2563_v7, %v2614_v22  ;;  %v896_v6 = vsel %vm889_vm4, %v2614_v22, %v2563_v7  ;;  %v841_v24 = vmul.f32 %v2050_v58, %v822_v63  ;;  %v891_v37 = vsel %vm889_vm4, %v4393_v42, %v4392_v31 }
 0x241   : > { %1610 = vrot.lane.b32.xlu0 %v2475_v47, %s2235_s14  ;;  %v842_v7 = vmul.f32 %v2051_v4, %v816_v19  ;;  %v843_v22 = vmul.f32 %v2052_v60, %v823_v57  ;;  %v844_v39 = vmul.f32 %v2053_v11, %v817_v55  ;;  %v897_v14 = vsel %vm889_vm4, %v4392_v31, %v4393_v42  ;;  %v1180_v11 = vld [vmem:[#allocation2] sm:$0xff]  ;;  %v1181_v55 = vld [vmem:[#allocation2 + $0x8] sm:$0xff]  ;;  %v4395_v57 = vld [vmem:[#allocation32_spill] sm:$0xff] }
 0x242   : > { %v1417_v32 = vpop.permute.xlu1 %1416  ;;  %v1421_v21 = vpop.permute.xlu0 %1420  ;;  %v708_v43 = vadd.f32 %v696_v0, %v3189_v16  ;;  %v779_v59 = vadd.f32 %v767_v41, %v631_v12  ;;  %v915_v2 = vmul.f32 %v2062_v34, %v890_v1  ;;  %v780_v18 = vadd.f32 %v768_v29, %v632_v50  ;;  %v1552_v41 = vld [vmem:[#allocation2 + $0x200] sm:$0xff] }
 0x243   : > { %v3318_v48 = vsel %vm1426_vm9, %v1415_v13, %v1421_v21  ;;  %v3322_v25 = vsel %vm1426_vm9, %v1421_v21, %v1415_v13  ;;  %v916_v13 = vmul.f32 %v2063_v8, %v896_v6  ;;  %v917_v54 = vmul.f32 %v2064_v28, %v891_v37  ;;  %v4397_v34 = vld [vmem:[#allocation21_spill] sm:$0xff] }
 0x244   : > { %1612 = vrot.lane.b32.xlu1 %v2535_v62, %s2235_s14  ;;  %v781_v4 = vadd.f32 %v769_v5, %v633_v17  ;;  %v782_v19 = vadd.f32 %v770_v20, %v634_v36  ;;  %v918_v60 = vmul.f32 %v2065_v53, %v897_v14  ;;  %vm1540_vm15 = vcmp.lt.s32.totalorder %v2677_v52, 110  ;;  %v1553_v17 = vld [vmem:[#allocation2 + $0x208] sm:$0xff]  ;;  %v1182_v20 = vld [vmem:[#allocation2 + $0x10] sm:$0xff]  ;;  %v4398_v8 = vld [vmem:[#allocation33_spill] sm:$0xff] }
 0x245   : > { %1642 = vrot.lane.b32.xlu0 %v2457_v44, %s2236_s16  ;;  %v3347_v16 = vadd.f32 %v841_v24, %v705_v26  ;;  %v3349_v12 = vadd.f32 %v842_v7, %v706_v38  ;;  %v3351_v50 = vadd.f32 %v843_v22, %v707_v15  ;;  %v3353_v0 = vadd.f32 %v844_v39, %v708_v43  ;;  %v4396_v26 = vld [vmem:[#allocation20_spill] sm:$0xff]  ;;  %v4399_v39 = vld [vmem:[#allocation34_spill] sm:$0xff]  ;;  %v1590_v43 = vld [vmem:[#allocation2 + $0x230] sm:$0xff] }
 0x246   : > { %v1423_v3 = vpop.permute.xlu1 %1422  ;;  %v1533_v63 = vpop.permute.xlu0 %1532  ;;  %v3357_v36 = vadd.f32 %v915_v2, %v779_v59  ;;  %v3359_v29 = vadd.f32 %v916_v13, %v780_v18  ;;  %v1174_v38 = vsel %vm1173_vm12, %v4396_v26, %v4395_v57  ;;  %v1177_v15 = vsel %vm1173_vm12, %v4395_v57, %v4396_v26  ;;  %v4400_v53 = vld [vmem:[#allocation22_spill] sm:$0xff]  ;;  %v1591_v59 = vld [vmem:[#allocation2 + $0x238] sm:$0xff]  ;;  %v1212_v57 = vld [vmem:[#allocation2 + $0x30] sm:$0xff] }
 0x247   : > { %v3338_v40 = vsel %vm1426_vm9, %v1417_v32, %v1423_v3  ;;  %v3342_v58 = vsel %vm1426_vm9, %v1423_v3, %v1417_v32  ;;  %v3369_v5 = vadd.f32 %v917_v54, %v781_v4  ;;  %v1178_v1 = vsel %vm1173_vm12, %v4398_v8, %v4397_v34  ;;  %v2037_v4 = vld [vmem:[%s4261_s3 + $0x118] sm:$0xff] }
 0x248   : > { %4394 = vst [vmem:[#allocation11_spill] sm:$0xff] %v3338_v40  ;;  %1644 = vrot.lane.b32.xlu1 %v2493_v51, %s2236_s16  ;;  %v3379_v28 = vadd.f32 %v918_v60, %v782_v19  ;;  %vm1578_vm9 = vcmp.lt.s32.totalorder %v2677_v52, 98  ;;  %v3384_v37 = vmul.f32 %v1180_v11, %v1177_v15  ;;  %v3386_v7 = vmul.f32 %v1181_v55, %v1174_v38  ;;  %v4403_v19 = vld [vmem:[#allocation57_spill] sm:$0xff]  ;;  %v4404_v60 = vld [vmem:[#allocation47_spill] sm:$0xff]  ;;  %v1183_v55 = vld [vmem:[#allocation2 + $0x18] sm:$0xff] }
 0x249   : > { %1648 = vrot.lane.b32.xlu0 %v2475_v47, %s2236_s16  ;;  %v1175_v22 = vsel %vm1173_vm12, %v4397_v34, %v4398_v8  ;;  %v1205_v14 = vsel %vm1204_vm10, %v4400_v53, %v4399_v39  ;;  %v3398_v2 = vmul.f32 %v1182_v20, %v1178_v1  ;;  %v1208_v13 = vsel %vm1204_vm10, %v4399_v39, %v4400_v53  ;;  %v1213_v26 = vld [vmem:[#allocation2 + $0x38] sm:$0xff]  ;;  %v4405_v38 = vld [vmem:[#allocation35_spill] sm:$0xff]  ;;  %v1214_v1 = vld [vmem:[#allocation2 + $0x40] sm:$0xff] }
 0x24a   : > { %v1539_v32 = vpop.permute.xlu1 %1538  ;;  %v1571_v24 = vpop.permute.xlu0 %1570  ;;  %v4406_v15 = vld [vmem:[#allocation23_spill] sm:$0xff]  ;;  %v2061_v39 = vld [vmem:[%s4261_s3 + $0x1d8] sm:$0xff] }
 0x24b   : > { %v1543_v6 = vsel %vm1540_vm15, %v1533_v63, %v1539_v32  ;;  %v1546_v21 = vsel %vm1540_vm15, %v1539_v32, %v1533_v63  ;;  %v2036_v63 = vld [vmem:[%s4261_s3 + $0x110] sm:$0xff]  ;;  %v1206_v32 = vsel %vm1204_vm10, %v4406_v15, %v4405_v38  ;;  %v1209_v20 = vsel %vm1204_vm10, %v4405_v38, %v4406_v15 }
 0x24c   : > { %v1558_v31 = vmul.f32 %v1552_v41, %v1543_v6  ;;  %v1559_v42 = vmul.f32 %v1553_v17, %v1546_v21  ;;  %1650 = vrot.lane.b32.xlu1 %v2535_v62, %s2236_s16  ;;  %v673_v41 = vsel %vm667_vm2, %v4404_v60, %v4403_v19  ;;  %v4407_v6 = vld [vmem:[#allocation36_spill] sm:$0xff]  ;;  %v4409_v53 = vld [vmem:[#allocation59_spill] sm:$0xff]  ;;  %vm4429_vm10 = vcmp.lt.s32.totalorder %v2677_v52, 112 }
 0x24d   : > { %1019 = vrot.lane.b32.xlu0 %v2457_v44, %s4371_s13  ;;  %v4408_v21 = vld [vmem:[#allocation24_spill] sm:$0xff]  ;;  %v704_v38 = vmul.f32 %v2037_v4, %v673_v41  ;;  %v1246_v4 = vld [vmem:[#allocation2 + $0x70] sm:$0xff]  ;;  %v4414_v41 = vld [vmem:[#allocation37_spill] sm:$0xff] }
 0x24e   : > { %v3405_v3 = vadd.f32 %v1558_v31, %v3099_v9  ;;  %v3408_v18 = vadd.f32 %v1559_v42, %v3101_v10  ;;  %v1577_v54 = vpop.permute.xlu1 %1576  ;;  %v679_v9 = vsel %vm667_vm2, %v4403_v19, %v4404_v60  ;;  %v876_v11 = vpop.permute.xlu0 %875  ;;  %v1240_v31 = vsel %vm1236_vm11, %v4407_v6, %v4408_v21  ;;  %v2060_v42 = vld [vmem:[%s4261_s3 + $0x1d0] sm:$0xff]  ;;  %v1215_v19 = vld [vmem:[#allocation2 + $0x48] sm:$0xff]  ;;  %v1244_v60 = vld [vmem:[#allocation2 + $0x60] sm:$0xff] }
 0x24f   : > { %v1581_v10 = vsel %vm1578_vm9, %v1571_v24, %v1577_v54  ;;  %v1584_v17 = vsel %vm1578_vm9, %v1577_v54, %v1571_v24  ;;  %v1237_v24 = vsel %vm1236_vm11, %v4408_v21, %v4407_v6  ;;  %vm4431_vm12 = vmmov %vm4429_vm10 }
 0x250   : > { %4401 = vst [vmem:[#allocation8_spill] sm:$0xff] %v3405_v3  ;;  %4402 = vst [vmem:[#allocation32_spill] sm:$0xff] %v3408_v18  ;;  %v1596_v34 = vmul.f32 %v1590_v43, %v1581_v10  ;;  %v1597_v8 = vmul.f32 %v1591_v59, %v1584_v17  ;;  %1021 = vrot.lane.b32.xlu1 %v2493_v51, %s4371_s13  ;;  %v4410_v43 = vld [vmem:[#allocation51_spill] sm:$0xff]  ;;  %v1245_v10 = vld [vmem:[#allocation2 + $0x68] sm:$0xff]  ;;  %v703_v17 = vmul.f32 %v2036_v63, %v679_v9 }
 0x251   : > { %v821_v59 = vsel %vm815_vm7, %v4410_v43, %v4409_v53  ;;  %v827_v54 = vsel %vm815_vm7, %v4409_v53, %v4410_v43  ;;  %1031 = vrot.lane.b32.xlu0 %v2475_v47, %s4371_s13  ;;  %v1189_v18 = vmul.f32 %v1183_v55, %v1175_v22  ;;  %v1218_v3 = vmul.f32 %v1212_v57, %v1208_v13 }
 0x252   : > { %v3463_v15 = vadd.f32 %v1596_v34, %v3140_v56  ;;  %v3466_v6 = vadd.f32 %v1597_v8, %v3142_v23  ;;  %v888_v21 = vpop.permute.xlu1 %887  ;;  %v950_v40 = vpop.permute.xlu0 %949  ;;  %v3476_v63 = vmul.f32 %v1213_v26, %v1205_v14  ;;  %v4413_v56 = vld [vmem:[#allocation25_spill] sm:$0xff]  ;;  %v851_v9 = vmul.f32 %v2060_v42, %v827_v54  ;;  %v2084_v14 = vld [vmem:[%s4261_s3 + $0x290] sm:$0xff]  ;;  %v2085_v26 = vld [vmem:[%s4261_s3 + $0x298] sm:$0xff] }
 0x253   : > { %v3470_v53 = vsel %vm889_vm4, %v876_v11, %v888_v21  ;;  %v3474_v43 = vsel %vm889_vm4, %v888_v21, %v876_v11  ;;  %v1241_v23 = vsel %vm1236_vm11, %v4414_v41, %v4413_v56  ;;  %v852_v22 = vmul.f32 %v2061_v39, %v821_v59  ;;  %v1247_v34 = vld [vmem:[#allocation2 + $0x78] sm:$0xff]  ;;  %v4415_v8 = vld [vmem:[#allocation26_spill] sm:$0xff] }
 0x254   : > { %4411 = vst [vmem:[#allocation20_spill] sm:$0xff] %v3463_v15  ;;  %4412 = vst [vmem:[#allocation21_spill] sm:$0xff] %v3466_v6  ;;  %1033 = vrot.lane.b32.xlu1 %v2535_v62, %s4371_s13  ;;  %v3484_v13 = vmul.f32 %v1214_v1, %v1209_v20  ;;  %v3486_v55 = vmul.f32 %v1215_v19, %v1206_v32  ;;  %v1250_v11 = vmul.f32 %v1244_v60, %v1240_v31  ;;  %v1282_v20 = vld [vmem:[#allocation2 + $0x90] sm:$0xff]  ;;  %v4416_v1 = vld [vmem:[#allocation38_spill] sm:$0xff]  ;;  %s2117_s13 = sshll.u32 %s4494_s10, 5 }
 0x255   : > { %v1251_v57 = vmul.f32 %v1245_v10, %v1237_v24  ;;  %1093 = vrot.lane.b32.xlu0 %v2457_v44, %s4376_s24  ;;  %v1238_v32 = vsel %vm1236_vm11, %v4413_v56, %v4414_v41  ;;  %v1278_v24 = vsel %vm1274_vm13, %v4416_v1, %v4415_v8  ;;  %v715_v31 = vadd.f32 %v703_v17, %v3211_v30  ;;  %v1283_v21 = vld [vmem:[#allocation2 + $0x98] sm:$0xff]  ;;  %v1320_v41 = vld [vmem:[#allocation2 + $0xc0] sm:$0xff]  ;;  %vm4430_vm11 = vmmov %vm4429_vm10  ;;  %s347_s14 = scalar_lea.vmem %s4267_s9, %s2117_s13 }
 0x256   : > { %v716_v42 = vadd.f32 %v704_v38, %v3214_v45  ;;  %v962_v39 = vpop.permute.xlu1 %961  ;;  %v1252_v59 = vmul.f32 %v1246_v4, %v1241_v23  ;;  %v1275_v54 = vsel %vm1274_vm13, %v4415_v8, %v4416_v1  ;;  %v3514_v10 = vpop.permute.xlu0 %1013  ;;  %v1253_v38 = vmul.f32 %v1247_v34, %v1238_v32  ;;  %v1321_v23 = vld [vmem:[#allocation2 + $0xc8] sm:$0xff]  ;;  %v4417_v8 = vld [vmem:[#allocation40_spill] sm:$0xff] }
 0x257   : > { %v969_v19 = vsel %vm963_vm5, %v950_v40, %v962_v39  ;;  %v975_v60 = vsel %vm963_vm5, %v962_v39, %v950_v40  ;;  %v863_v56 = vadd.f32 %v851_v9, %v715_v31  ;;  %v1288_v4 = vmul.f32 %v1282_v20, %v1278_v24  ;;  %v4418_v1 = vld [vmem:[#allocation28_spill] sm:$0xff]  ;;  %v1322_v24 = vld [vmem:[#allocation2 + $0xd0] sm:$0xff]  ;;  %v4422_v39 = vld [vmem:[#allocation29_spill] sm:$0xff] }
 0x258   : > { %v864_v30 = vadd.f32 %v852_v22, %v716_v42  ;;  %v999_v17 = vmul.f32 %v2084_v14, %v969_v19  ;;  %v1000_v45 = vmul.f32 %v2085_v26, %v975_v60  ;;  %1095 = vrot.lane.b32.xlu1 %v2493_v51, %s4376_s24  ;;  %v1313_v6 = vsel %vm1312_vm14, %v4418_v1, %v4417_v8  ;;  %v1323_v31 = vld [vmem:[#allocation2 + $0xd8] sm:$0xff]  ;;  %v4421_v42 = vld [vmem:[#allocation41_spill] sm:$0xff] }
 0x259   : > { %v1316_v40 = vsel %vm1312_vm14, %v4417_v8, %v4418_v1  ;;  %1105 = vrot.lane.b32.xlu0 %v2475_v47, %s4376_s24  ;;  %v1256_v9 = vadd.f32 %v1250_v11, %v3384_v37  ;;  %v1257_v22 = vadd.f32 %v1251_v57, %v3386_v7  ;;  %v1258_v32 = vadd.f32 %v1252_v59, %v3398_v2  ;;  %v2074_v2 = vld [vmem:[%s4261_s3 + $0x240] sm:$0xff]  ;;  %v2075_v59 = vld [vmem:[%s4261_s3 + $0x248] sm:$0xff] }
 0x25a   : > { %v3530_v14 = vadd.f32 %v999_v17, %v863_v56  ;;  %v3532_v26 = vadd.f32 %v1000_v45, %v864_v30  ;;  %v1016_v34 = vpop.permute.xlu1 %1015  ;;  %v3535_v20 = vmul.f32 %v1283_v21, %v1275_v54  ;;  %v1314_v19 = vsel %vm1312_vm14, %v4422_v39, %v4421_v42  ;;  %v1026_v7 = vpop.permute.xlu0 %1025  ;;  %v4423_v54 = vld [vmem:[#allocation9_spill] sm:$0xff]  ;;  %v1285_v17 = vld [vmem:[#allocation2 + $0xa8] sm:$0xff]  ;;  %v4424_v45 = vld [vmem:[#allocation39_spill] sm:$0xff] }
 0x25b   : > { %v1317_v37 = vsel %vm1312_vm14, %v4421_v42, %v4422_v39  ;;  %v1326_v11 = vmul.f32 %v1320_v41, %v1316_v40  ;;  %v1327_v57 = vmul.f32 %v1321_v23, %v1313_v6  ;;  %v964_v60 = vsel %vm963_vm5, %v4423_v54, %v3103_v35  ;;  %v1284_v30 = vld [vmem:[#allocation2 + $0xa0] sm:$0xff]  ;;  %v4425_v41 = vld [vmem:[#allocation27_spill] sm:$0xff] }
 0x25c   : > { %4419 = vst [vmem:[#allocation33_spill] sm:$0xff] %v3530_v14  ;;  %4420 = vst [vmem:[#allocation34_spill] sm:$0xff] %v3532_v26  ;;  %v970_v21 = vsel %vm963_vm5, %v3103_v35, %v4423_v54  ;;  %1107 = vrot.lane.b32.xlu1 %v2535_v62, %s4376_s24  ;;  %v1259_v6 = vadd.f32 %v1253_v38, %v1189_v18  ;;  %v3561_v56 = vadd.f32 %v1288_v4, %v1218_v3  ;;  %v1358_v18 = vld [vmem:[#allocation2 + $0xf0] sm:$0xff]  ;;  %v1359_v3 = vld [vmem:[#allocation2 + $0xf8] sm:$0xff] }
 0x25d   : > { %v1276_v23 = vsel %vm1274_vm13, %v4425_v41, %v4424_v45  ;;  %v1279_v8 = vsel %vm1274_vm13, %v4424_v45, %v4425_v41  ;;  %1680 = vrot.lane.b32.xlu0 %v2457_v44, %s2237_s15  ;;  %v1328_v35 = vmul.f32 %v1322_v24, %v1317_v37  ;;  %v1329_v1 = vmul.f32 %v1323_v31, %v1314_v19  ;;  %v4426_v38 = vld [vmem:[#allocation42_spill] sm:$0xff]  ;;  %v2076_v24 = vld [vmem:[%s4261_s3 + $0x250] sm:$0xff]  ;;  %v2077_v31 = vld [vmem:[%s4261_s3 + $0x258] sm:$0xff] }
 0x25e   : > { %v4427_v4 = vld [vmem:[#allocation30_spill] sm:$0xff]  ;;  %v1028_v39 = vpop.permute.xlu1 %1027  ;;  %v989_v54 = vmul.f32 %v2074_v2, %v964_v60  ;;  %v990_v45 = vmul.f32 %v2075_v59, %v970_v21  ;;  %v1088_v2 = vpop.permute.xlu0 %1087  ;;  %v3595_v59 = vmul.f32 %v1284_v30, %v1279_v8  ;;  %v3597_v60 = vmul.f32 %v1285_v17, %v1276_v23  ;;  %v2089_v23 = vld [vmem:[%s4261_s3 + $0x2b8] sm:$0xff]  ;;  %vm4432_vm13 = vmmov %vm4429_vm10 }
 0x25f   : > { %v1351_v40 = vsel %vm1350_vm0, %v4427_v4, %v4426_v38  ;;  %v1354_v42 = vsel %vm1350_vm0, %v4426_v38, %v4427_v4  ;;  %v4428_v19 = vld [vmem:[#allocation10_spill] sm:$0xff]  ;;  %v3599_v21 = vadd.f32 %v1326_v11, %v1256_v9  ;;  %v3601_v38 = vadd.f32 %v1327_v57, %v1257_v22  ;;  %v2088_v11 = vld [vmem:[%s4261_s3 + $0x2b0] sm:$0xff] }
 0x260   : > { %v965_v37 = vsel %vm963_vm5, %v4428_v19, %v3129_v49  ;;  %v971_v41 = vsel %vm963_vm5, %v3129_v49, %v4428_v19  ;;  %1682 = vrot.lane.b32.xlu1 %v2493_v51, %s2237_s15  ;;  %v3605_v4 = vmul.f32 %v1358_v18, %v1354_v42  ;;  %v3607_v15 = vmul.f32 %v1359_v3, %v1351_v40  ;;  %v2086_v49 = vld [vmem:[%s4261_s3 + $0x2a0] sm:$0xff]  ;;  %v2087_v30 = vld [vmem:[%s4261_s3 + $0x2a8] sm:$0xff] }
 0x261   : > { %v1038_v9 = vsel %vm4429_vm10, %v3514_v10, %v1026_v7  ;;  %v1044_v22 = vsel %vm4430_vm11, %v1026_v7, %v3514_v10  ;;  %1686 = vrot.lane.b32.xlu0 %v2475_v47, %s2237_s15  ;;  %v991_v57 = vmul.f32 %v2076_v24, %v965_v37  ;;  %v992_v17 = vmul.f32 %v2077_v31, %v971_v41  ;;  %v2098_v7 = vld [vmem:[%s4261_s3 + $0x300] sm:$0xff]  ;;  %v2099_v3 = vld [vmem:[%s4261_s3 + $0x308] sm:$0xff] }
 0x262   : > { %v1039_v8 = vsel %vm4431_vm12, %v1016_v34, %v1028_v39  ;;  %v1045_v18 = vsel %vm4432_vm13, %v1028_v39, %v1016_v34  ;;  %v1090_v10 = vpop.permute.xlu1 %1089  ;;  %v1334_v40 = vadd.f32 %v1328_v35, %v1258_v32  ;;  %v1335_v42 = vadd.f32 %v1329_v1, %v1259_v6  ;;  %v1396_v19 = vld [vmem:[#allocation2 + $0x120] sm:$0xff]  ;;  %v1397_v37 = vld [vmem:[#allocation2 + $0x128] sm:$0xff]  ;;  %v1100_v41 = vpop.permute.xlu0 %1099  ;;  %v2101_v1 = vld [vmem:[%s4261_s3 + $0x318] sm:$0xff] }
 0x263   : > { %v1001_v24 = vadd.f32 %v989_v54, %v3347_v16  ;;  %v1002_v31 = vadd.f32 %v990_v45, %v3349_v12  ;;  %v1063_v26 = vmul.f32 %v2086_v49, %v1038_v9  ;;  %v1064_v34 = vmul.f32 %v2087_v30, %v1044_v22  ;;  %v2100_v12 = vld [vmem:[%s4261_s3 + $0x310] sm:$0xff]  ;;  %v1399_v30 = vld [vmem:[#allocation2 + $0x138] sm:$0xff] }
 0x264   : > { %vm4433_vm14 = vcmp.lt.s32.totalorder %v2677_v52, 111  ;;  %1688 = vrot.lane.b32.xlu1 %v2535_v62, %s2237_s15  ;;  %v1065_v32 = vmul.f32 %v2088_v11, %v1039_v8  ;;  %v1066_v6 = vmul.f32 %v2089_v23, %v1045_v18  ;;  %v1003_v54 = vadd.f32 %v991_v57, %v3351_v50 }
 0x265   : > { %v1112_v39 = vsel %vm4433_vm14, %v1088_v2, %v1100_v41  ;;  %vm4434_vm10 = vmmov %vm4433_vm14  ;;  %1718 = vrot.lane.b32.xlu0 %v2457_v44, %s2238_s18  ;;  %v1004_v45 = vadd.f32 %v992_v17, %v3353_v0  ;;  %v1403_v49 = vmul.f32 %v1397_v37, %v3200_v27  ;;  %v1075_v50 = vadd.f32 %v1063_v26, %v3357_v36  ;;  %v4437_v37 = vld [vmem:[#allocation43_spill] sm:$0xff] }
 0x266   : > { %v1118_v14 = vsel %vm4434_vm10, %v1100_v41, %v1088_v2  ;;  %v1137_v35 = vmul.f32 %v2098_v7, %v1112_v39  ;;  %v1402_v2 = vmul.f32 %v1396_v19, %v3204_v33  ;;  %v1102_v9 = vpop.permute.xlu1 %1101  ;;  %vm4435_vm11 = vmmov %vm4434_vm10  ;;  %v1453_v18 = vpop.permute.xlu0 %1452  ;;  %v1076_v0 = vadd.f32 %v1064_v34, %v3359_v29  ;;  %v1472_v29 = vld [vmem:[#allocation2 + $0x180] sm:$0xff] }
 0x267   : > { %v1138_v16 = vmul.f32 %v2099_v3, %v1118_v14  ;;  %v1398_v14 = vld [vmem:[#allocation2 + $0x130] sm:$0xff]  ;;  %v1113_v23 = vsel %vm4435_vm11, %v1090_v10, %v1102_v9  ;;  %vm4436_vm12 = vmmov %vm4434_vm10  ;;  %v1405_v17 = vmul.f32 %v1399_v30, %v3243_v46  ;;  %v1077_v7 = vadd.f32 %v1065_v32, %v3369_v5 }
 0x268   : > { %v1149_v22 = vadd.f32 %v1137_v35, %v1001_v24  ;;  %v1119_v8 = vsel %vm4436_vm12, %v1102_v9, %v1090_v10  ;;  %v1139_v57 = vmul.f32 %v2100_v12, %v1113_v23  ;;  %1720 = vrot.lane.b32.xlu1 %v2493_v51, %s2238_s18  ;;  %v1404_v27 = vmul.f32 %v1398_v14, %v3247_v61  ;;  %v1473_v24 = vld [vmem:[#allocation2 + $0x188] sm:$0xff]  ;;  %v4438_v46 = vld [vmem:[#allocation31_spill] sm:$0xff]  ;;  %v1435_v14 = vld [vmem:[#allocation2 + $0x158] sm:$0xff] }
 0x269   : > { %v1150_v11 = vadd.f32 %v1138_v16, %v1002_v31  ;;  %v1140_v33 = vmul.f32 %v2101_v1, %v1119_v8  ;;  %v1078_v3 = vadd.f32 %v1066_v6, %v3379_v28  ;;  %1724 = vrot.lane.b32.xlu0 %v2475_v47, %s2238_s18  ;;  %v369_v31 = vld [vmem:[%s4266_s8] sm:$0xff]  ;;  %v1352_v5 = vsel %vm1350_vm0, %v4438_v46, %v4437_v37  ;;  %vm4449_vm14 = vmmov %vm4434_vm10 }
 0x26a   : > { %v1151_v10 = vadd.f32 %v1139_v57, %v1003_v54  ;;  %v1455_v26 = vpop.permute.xlu1 %1454  ;;  %v1756_v61 = vadd.f32 %v1149_v22, %v1075_v50  ;;  %v1355_v28 = vsel %vm1350_vm0, %v4437_v37, %v4438_v46  ;;  %v1408_v41 = vadd.f32 %v1402_v2, %v3599_v21  ;;  %v1459_v39 = vpop.permute.xlu0 %1458  ;;  %v1474_v21 = vld [vmem:[#allocation2 + $0x190] sm:$0xff]  ;;  %v1475_v2 = vld [vmem:[#allocation2 + $0x198] sm:$0xff]  ;;  %v1360_v8 = vld [vmem:[#allocation2 + $0x100] sm:$0xff] }
 0x26b   : > { %v1152_v36 = vadd.f32 %v1140_v33, %v1004_v45  ;;  %v1757_v19 = vadd.f32 %v1150_v11, %v1076_v0  ;;  %v1409_v34 = vadd.f32 %v1403_v49, %v3601_v38  ;;  %v1465_v32 = vsel %vm1464_vm8, %v1453_v18, %v1459_v39  ;;  %v370_v38 = vld [vmem:[%s4266_s8 + $0x8] sm:$0xff]  ;;  %v1434_v49 = vld [vmem:[#allocation2 + $0x150] sm:$0xff] }
 0x26c   : > { %v1468_v6 = vsel %vm1464_vm8, %v1459_v39, %v1453_v18  ;;  %1726 = vrot.lane.b32.xlu1 %v2535_v62, %s2238_s18  ;;  %v1758_v16 = vadd.f32 %v1151_v10, %v1077_v7  ;;  %v1410_v12 = vadd.f32 %v1404_v27, %v1334_v40  ;;  %v1411_v1 = vadd.f32 %v1405_v17, %v1335_v42  ;;  %v1361_v18 = vld [vmem:[#allocation2 + $0x108] sm:$0xff] }
 0x26d   : > { %v1759_v35 = vadd.f32 %v1152_v36, %v1078_v3  ;;  %v1478_v54 = vmul.f32 %v1472_v29, %v1465_v32  ;;  %v1479_v45 = vmul.f32 %v1473_v24, %v1468_v6  ;;  %1904 = vperm.xlu0 %2164, %v369_v31   ;;  %v1763_v9 = vmax.f32 %v1757_v19, 0.0  ;;  %v1436_v24 = vld [vmem:[#allocation2 + $0x160] sm:$0xff]  ;;  %v1437_v31 = vld [vmem:[#allocation2 + $0x168] sm:$0xff] }
 0x26e   : > { %v1461_v30 = vpop.permute.xlu1 %1460  ;;  %v1762_v11 = vmax.f32 %v1756_v61, 0.0  ;;  %v1764_v23 = vmax.f32 %v1758_v16, 0.0  ;;  %v1491_v57 = vpop.permute.xlu0 %1490  ;;  %v1295_v3 = vadd.f32 %v3535_v20, %v3476_v63  ;;  %v1296_v10 = vadd.f32 %v3595_v59, %v3484_v13  ;;  %v367_v20 = vld [vmem:[%s4264_s6] sm:$0xf]  ;;  %v1513_v6 = vld [vmem:[#allocation2 + $0x1c8] sm:$0xff] }
 0x26f   : > { %v1765_v22 = vmax.f32 %v1759_v35, 0.0  ;;  %v3695_v40 = vadd.f32 %v1478_v54, %v1408_v41  ;;  %v3697_v42 = vadd.f32 %v1479_v45, %v1409_v34  ;;  %v1466_v50 = vsel %vm1464_vm8, %v1455_v26, %v1461_v30  ;;  %v1510_v41 = vld [vmem:[#allocation2 + $0x1b0] sm:$0xff]  ;;  %v1511_v34 = vld [vmem:[#allocation2 + $0x1b8] sm:$0xff]  ;;  %v1512_v32 = vld [vmem:[#allocation2 + $0x1c0] sm:$0xff] }
 0x270   : > { %v1469_v0 = vsel %vm1464_vm8, %v1461_v30, %v1455_v26  ;;  %v1480_v33 = vmul.f32 %v1474_v21, %v1466_v50  ;;  %1909 = vperm.xlu1 %2165, %v370_v38   ;;  %v1792_v7 = vpack.c.bf16 %v1764_v23, %v1762_v11  ;;  %v1440_v36 = vmul.f32 %v1434_v49, %v3322_v25  ;;  %v4441_v50 = vld [vmem:[#allocation56_spill] sm:$0xff] }
 0x271   : > { %v1481_v27 = vmul.f32 %v1475_v2, %v1469_v0  ;;  %v1793_v17 = vpack.c.bf16 %v1765_v22, %v1763_v9  ;;  %v1441_v29 = vmul.f32 %v1435_v14, %v3318_v48  ;;  %v1366_v19 = vmul.f32 %v1360_v8, %v1355_v28  ;;  %v2024_v8 = vld [vmem:[%s4261_s3 + $0xb0] sm:$0xff]  ;;  %v4442_v0 = vld [vmem:[#allocation45_spill] sm:$0xff] }
 0x272   : > { %v1367_v26 = vmul.f32 %v1361_v18, %v1352_v5  ;;  %v3709_v61 = vadd.f32 %v1480_v33, %v1410_v12  ;;  %v1493_v46 = vpop.permute.xlu1 %1492  ;;  %v1297_v63 = vadd.f32 %v3597_v60, %v3486_v55  ;;  %v1370_v25 = vadd.f32 %v3605_v4, %v3561_v56  ;;  %v1497_v13 = vpop.permute.xlu0 %1496  ;;  %v4439_v5 = vld [vmem:[#allocation11_spill] sm:$0xff]  ;;  %v2025_v18 = vld [vmem:[%s4261_s3 + $0xb8] sm:$0xff] }
 0x273   : > { %v3711_v37 = vadd.f32 %v1481_v27, %v1411_v1  ;;  %1821 = vmatprep.subr.bf16.mxu1 %v1793_v17  ;;  %v1371_v48 = vadd.f32 %v3607_v15, %v1295_v3  ;;  %vm1796_vm8 = vcmask 195584   ;;  %v1442_v59 = vmul.f32 %v1436_v24, %v3342_v58  ;;  %v2048_v17 = vld [vmem:[%s4261_s3 + $0x170] sm:$0xff]  ;;  %v4443_v3 = vld [vmem:[#allocation58_spill] sm:$0xff] }
 0x274   : > { %1822 = vmatpush1.bf16.msra.mxu1 %v1792_v7  ;;  %v1443_v28 = vmul.f32 %v1437_v31, %v4439_v5  ;;  %v1503_v39 = vsel %vm1502_vm6, %v1491_v57, %v1497_v13  ;;  %v1506_v55 = vsel %vm1502_vm6, %v1497_v13, %v1491_v57  ;;  %v1446_v56 = vadd.f32 %v1440_v36, %v1370_v25  ;;  %v2049_v7 = vld [vmem:[%s4261_s3 + $0x178] sm:$0xff]  ;;  %v2096_v25 = vld [vmem:[%s4261_s3 + $0x2f0] sm:$0xff] }
 0x275   : > { %v1447_v60 = vadd.f32 %v1441_v29, %v1371_v48  ;;  %v1516_v15 = vmul.f32 %v1510_v41, %v1503_v39  ;;  %v1517_v4 = vmul.f32 %v1511_v34, %v1506_v55  ;;  %v1372_v35 = vadd.f32 %v1366_v19, %v1296_v10  ;;  %v4444_v10 = vld [vmem:[#allocation49_spill] sm:$0xff]  ;;  %v2097_v48 = vld [vmem:[%s4261_s3 + $0x2f8] sm:$0xff]  ;;  %v4447_v5 = vld [vmem:[#allocation7_spill] sm:$0xff] }
 0x276   : > { %v1373_v16 = vadd.f32 %v1367_v26, %v1297_v63  ;;  %v1499_v12 = vpop.permute.xlu1 %1498  ;;  %v3736_v21 = vpop.permute.xlu0 %1608  ;;  %v4440_v2 = vmov 0   ;;  %v599_v57 = vsel %vm593_vm1, %v4442_v0, %v4441_v50  ;;  %v605_v33 = vsel %vm593_vm1, %v4441_v50, %v4442_v0  ;;  %v2072_v26 = vld [vmem:[%s4261_s3 + $0x230] sm:$0xff] }
 0x277   : > { %2111 = vmatmul.mubr.msk.bf16.vlgmr.msra.gmra.mxu1 %vm1796_vm8, %v367_v20  ;;  %v3728_v58 = vadd.f32 %v1516_v15, %v1446_v56  ;;  %v3730_v1 = vadd.f32 %v1517_v4, %v1447_v60  ;;  %v1504_v54 = vsel %vm1502_vm6, %v1493_v46, %v1499_v12  ;;  %v1507_v45 = vsel %vm1502_vm6, %v1499_v12, %v1493_v46  ;;  %v2073_v46 = vld [vmem:[%s4261_s3 + $0x238] sm:$0xff]  ;;  %vm4445_vm6 = vmmov %vm4432_vm13  ;;  %v2108_v60 = vld [vmem:[%s4261_s3 + $0x350] sm:$0xff] }
 0x278   : > { %1893 = vmatprep.mubr.bf16.mxu1 %v4440_v2  ;;  %v1448_v38 = vadd.f32 %v1442_v59, %v1372_v35  ;;  %v1449_v49 = vadd.f32 %v1443_v28, %v1373_v16  ;;  %v1518_v14 = vmul.f32 %v1512_v32, %v1504_v54  ;;  %v1519_v30 = vmul.f32 %v1513_v6, %v1507_v45  ;;  %vm4446_vm0 = vmmov %vm4445_vm6  ;;  %v2109_v15 = vld [vmem:[%s4261_s3 + $0x358] sm:$0xff] }
 0x279   : > { %v747_v36 = vsel %vm741_vm3, %v4444_v10, %v4443_v3  ;;  %v753_v29 = vsel %vm741_vm3, %v4443_v3, %v4444_v10  ;;  %v629_v31 = vmul.f32 %v2024_v8, %v605_v33  ;;  %v630_v19 = vmul.f32 %v2025_v18, %v599_v57  ;;  %vm4448_vm13 = vmmov %vm4434_vm10  ;;  %v4451_v18 = vld [vmem:[#allocation34_spill] sm:$0xff]  ;;  %v1548_v57 = vld [vmem:[#allocation2 + $0x1e0] sm:$0xff] }
 0x27a   : > { %v3739_v9 = vadd.f32 %v1518_v14, %v1448_v38  ;;  %v3741_v22 = vadd.f32 %v1519_v30, %v1449_v49  ;;  %v3743_v11 = vpop.permute.xlu1 %1614  ;;  %v3745_v23 = vpop.permute.xlu0 %1646  ;;  %v777_v41 = vmul.f32 %v2048_v17, %v753_v29  ;;  %v778_v34 = vmul.f32 %v2049_v7, %v747_v36  ;;  %v4450_v30 = vld [vmem:[#allocation33_spill] sm:$0xff]  ;;  %v1549_v33 = vld [vmem:[#allocation2 + $0x1e8] sm:$0xff] }
 0x27b   : > { %v641_v28 = vadd.f32 %v629_v31, %v4447_v5  ;;  %v642_v39 = vadd.f32 %v630_v19, %v4447_v5  ;;  %v925_v55 = vmul.f32 %v2072_v26, %v3470_v53  ;;  %v926_v56 = vmul.f32 %v2073_v46, %v3474_v43  ;;  %v1550_v31 = vld [vmem:[#allocation2 + $0x1f0] sm:$0xff]  ;;  %v1551_v19 = vld [vmem:[#allocation2 + $0x1f8] sm:$0xff] }
 0x27c   : > { %v1586_v5 = vld [vmem:[#allocation2 + $0x210] sm:$0xff]  ;;  %vm1654_vm10 = vcmp.lt.s32.totalorder %v2677_v52, 96  ;;  %vm1692_vm11 = vcmp.lt.s32.totalorder %v2677_v52, 95  ;;  %vm4456_vm12 = vcmask 1043456  }
 0x27d   : > { %v789_v4 = vadd.f32 %v777_v41, %v641_v28  ;;  %v790_v32 = vadd.f32 %v778_v34, %v642_v39  ;;  %v1587_v28 = vld [vmem:[#allocation2 + $0x218] sm:$0xff] }
 0x27e   : > { %v3761_v27 = vpop.permute.xlu1 %1652  ;;  %v1024_v24 = vpop.permute.xlu0 %1023 }
 0x27f   : > { %v937_v54 = vadd.f32 %v925_v55, %v789_v4  ;;  %v938_v45 = vadd.f32 %v926_v56, %v790_v32 }
 0x282   : > { %v1036_v63 = vpop.permute.xlu1 %1035  ;;  %v1098_v59 = vpop.permute.xlu0 %1097 }
 0x283   : > { %v1043_v13 = vsel %vm4445_vm6, %v1024_v24, %v1036_v63  ;;  %v1049_v20 = vsel %vm4446_vm0, %v1036_v63, %v1024_v24  ;;  %vm4457_vm6 = vmmov %vm4456_vm12 }
 0x284   : > { %v1073_v6 = vmul.f32 %v2096_v25, %v1043_v13  ;;  %v1074_v35 = vmul.f32 %v2097_v48, %v1049_v20 }
 0x286   : > { %v1110_v16 = vpop.permute.xlu1 %1109  ;;  %v1529_v43 = vpop.permute.xlu0 %1528  ;;  %v1085_v49 = vadd.f32 %v1073_v6, %v937_v54  ;;  %v1086_v14 = vadd.f32 %v1074_v35, %v938_v45  ;;  %v1666_v45 = vld [vmem:[#allocation2 + $0x290] sm:$0xff] }
 0x287   : > { %v1117_v12 = vsel %vm4448_vm13, %v1098_v59, %v1110_v16  ;;  %v1123_v53 = vsel %vm4449_vm14, %v1110_v16, %v1098_v59 }
 0x288   : > { %v1147_v2 = vmul.f32 %v2108_v60, %v1117_v12  ;;  %v1148_v38 = vmul.f32 %v2109_v15, %v1123_v53  ;;  %v1588_v15 = vld [vmem:[#allocation2 + $0x220] sm:$0xff]  ;;  %v1629_v53 = vld [vmem:[#allocation2 + $0x268] sm:$0xff] }
 0x289   : > { %v1628_v12 = vld [vmem:[#allocation2 + $0x260] sm:$0xff] }
 0x28a   : > { %v1159_v8 = vadd.f32 %v1147_v2, %v4450_v30  ;;  %v1160_v50 = vadd.f32 %v1148_v38, %v4451_v18  ;;  %v1531_v0 = vpop.permute.xlu1 %1530  ;;  %v1535_v17 = vpop.permute.xlu0 %1534  ;;  %v1667_v2 = vld [vmem:[#allocation2 + $0x298] sm:$0xff]  ;;  %v1657_v38 = vsel %vm1654_vm10, %v3745_v23, %v3761_v27  ;;  %v1704_v18 = vld [vmem:[#allocation2 + $0x2c0] sm:$0xff] }
 0x28b   : > { %v1541_v10 = vsel %vm1540_vm15, %v1529_v43, %v1535_v17  ;;  %v1544_v36 = vsel %vm1540_vm15, %v1535_v17, %v1529_v43  ;;  %v1672_v17 = vmul.f32 %v1666_v45, %v1657_v38 }
 0x28c   : > { %v3809_v7 = vadd.f32 %v1159_v8, %v1085_v49  ;;  %v3811_v3 = vadd.f32 %v1160_v50, %v1086_v14  ;;  %v1554_v29 = vmul.f32 %v1548_v57, %v1541_v10  ;;  %v1555_v24 = vmul.f32 %v1549_v33, %v1544_v36  ;;  %v1705_v50 = vld [vmem:[#allocation2 + $0x2c8] sm:$0xff] }
 0x28d   : > { %v1660_v49 = vsel %vm1654_vm10, %v3761_v27, %v3745_v23  ;;  %v1743_v27 = vld [vmem:[#allocation2 + $0x2f8] sm:$0xff] }
 0x28e   : > { %v1537_v26 = vpop.permute.xlu1 %1536  ;;  %v3818_v46 = vadd.f32 %v1554_v29, %v3695_v40  ;;  %v3821_v41 = vadd.f32 %v1555_v24, %v3697_v42  ;;  %v1567_v25 = vpop.permute.xlu0 %1566  ;;  %v1673_v23 = vmul.f32 %v1667_v2, %v1660_v49  ;;  %v4452_v29 = vld [vmem:[#allocation8_spill] sm:$0xff] }
 0x28f   : > { %v1542_v34 = vsel %vm1540_vm15, %v1531_v0, %v1537_v26  ;;  %v1545_v63 = vsel %vm1540_vm15, %v1537_v26, %v1531_v0  ;;  %vm1616_vm15 = vcmp.lt.s32.totalorder %v2677_v52, 97 }
 0x290   : > { %v1556_v48 = vmul.f32 %v1550_v31, %v1542_v34  ;;  %v1557_v13 = vmul.f32 %v1551_v19, %v1545_v63  ;;  %v1619_v43 = vsel %vm1616_vm15, %v3736_v21, %v3743_v11  ;;  %v4453_v31 = vld [vmem:[#allocation32_spill] sm:$0xff] }
 0x292   : > { %v3828_v20 = vadd.f32 %v1556_v48, %v3709_v61  ;;  %v3831_v59 = vadd.f32 %v1557_v13, %v3711_v37  ;;  %v1569_v40 = vpop.permute.xlu1 %1568  ;;  %v1573_v42 = vpop.permute.xlu0 %1572  ;;  %v1589_v61 = vld [vmem:[#allocation2 + $0x228] sm:$0xff]  ;;  %v4455_v13 = vld [vmem:[#allocation21_spill] sm:$0xff] }
 0x293   : > { %v1579_v39 = vsel %vm1578_vm9, %v1567_v25, %v1573_v42  ;;  %v1582_v55 = vsel %vm1578_vm9, %v1573_v42, %v1567_v25  ;;  %v4454_v25 = vld [vmem:[#allocation20_spill] sm:$0xff] }
 0x294   : > { %v1592_v56 = vmul.f32 %v1586_v5, %v1579_v39  ;;  %v1593_v60 = vmul.f32 %v1587_v28, %v1582_v55  ;;  %v1678_v48 = vadd.f32 %v1672_v17, %v4454_v25 }
 0x296   : > { %v1575_v37 = vpop.permute.xlu1 %1574  ;;  %v3841_v4 = vadd.f32 %v1592_v56, %v3728_v58  ;;  %v3844_v32 = vadd.f32 %v1593_v60, %v3730_v1  ;;  %v1685_v16 = vpop.permute.xlu0 %1684  ;;  %v1622_v58 = vsel %vm1616_vm15, %v3743_v11, %v3736_v21  ;;  %v1634_v11 = vmul.f32 %v1628_v12, %v1619_v43 }
 0x297   : > { %v1580_v6 = vsel %vm1578_vm9, %v1569_v40, %v1575_v37  ;;  %v1583_v35 = vsel %vm1578_vm9, %v1575_v37, %v1569_v40  ;;  %v1635_v8 = vmul.f32 %v1629_v53, %v1622_v58  ;;  %vm1730_vm9 = vcmp.lt.s32.totalorder %v2677_v52, 94 }
 0x298   : > { %v1594_v1 = vmul.f32 %v1588_v15, %v1580_v6  ;;  %v1595_v54 = vmul.f32 %v1589_v61, %v1583_v35  ;;  %v1640_v24 = vadd.f32 %v1634_v11, %v4452_v29  ;;  %v1679_v40 = vadd.f32 %v1673_v23, %v4455_v13 }
 0x299   : > { %v1641_v19 = vadd.f32 %v1635_v8, %v4453_v31 }
 0x29a   : > { %v3867_v14 = vadd.f32 %v1594_v1, %v3739_v9  ;;  %v3870_v30 = vadd.f32 %v1595_v54, %v3741_v22  ;;  %v1691_v21 = vpop.permute.xlu1 %1690  ;;  %v1723_v33 = vpop.permute.xlu0 %1722  ;;  %v1742_v9 = vld [vmem:[#allocation2 + $0x2f0] sm:$0xff] }
 0x29b   : > { %v1695_v0 = vsel %vm1692_vm11, %v1685_v16, %v1691_v21  ;;  %v1698_v57 = vsel %vm1692_vm11, %v1691_v21, %v1685_v16  ;;  %v1625_v21 = vld [vmem:[#allocation2 + $0x248] sm:$0xff] }
 0x29c   : > { %v1710_v22 = vmul.f32 %v1704_v18, %v1695_v0  ;;  %v1711_v10 = vmul.f32 %v1705_v50, %v1698_v57  ;;  %v1626_v57 = vld [vmem:[#allocation2 + $0x250] sm:$0xff] }
 0x29e   : > { %v1729_v36 = vpop.permute.xlu1 %1728  ;;  %v3883_v63 = vpop.permute.xlu0 %871  ;;  %v1716_v42 = vadd.f32 %v1710_v22, %v1640_v24  ;;  %v1717_v39 = vadd.f32 %v1711_v10, %v1641_v19  ;;  %v1662_v19 = vld [vmem:[#allocation2 + $0x270] sm:$0xff] }
 0x29f   : > { %v1733_v26 = vsel %vm1730_vm9, %v1723_v33, %v1729_v36  ;;  %v1736_v34 = vsel %vm1730_vm9, %v1729_v36, %v1723_v33  ;;  %v1627_v33 = vld [vmem:[#allocation2 + $0x258] sm:$0xff] }
 0x2a0   : > { %v1748_v5 = vmul.f32 %v1742_v9, %v1733_v26  ;;  %v1749_v28 = vmul.f32 %v1743_v27, %v1736_v34  ;;  %v1663_v26 = vld [vmem:[#allocation2 + $0x278] sm:$0xff] }
 0x2a2   : > { %v1754_v55 = vadd.f32 %v1748_v5, %v1678_v48  ;;  %v1755_v56 = vadd.f32 %v1749_v28, %v1679_v40  ;;  %v3887_v60 = vpop.permute.xlu1 %873  ;;  %v1664_v40 = vld [vmem:[#allocation2 + $0x280] sm:$0xff]  ;;  %v1665_v5 = vld [vmem:[#allocation2 + $0x288] sm:$0xff] }
 0x2a3   : > { %v3889_v15 = vpop.permute.xlu0 %883 }
 0x2a4   : > { %v1778_v61 = vadd.f32 %v1754_v55, %v1716_v42  ;;  %v1779_v37 = vadd.f32 %v1755_v56, %v1717_v39  ;;  %v2020_v56 = vld [vmem:[%s4261_s3 + $0x90] sm:$0xff] }
 0x2a6   : > { %v3891_v6 = vpop.permute.xlu1 %885  ;;  %v1785_v35 = vadd.f32 %v1779_v37, %v3811_v3  ;;  %v1784_v16 = vadd.f32 %v1778_v61, %v3809_v7  ;;  %v1624_v7 = vld [vmem:[#allocation2 + $0x240] sm:$0xff]  ;;  %v4461_v61 = vld [vmem:[#allocation16_spill] sm:$0xff] }
 0x2a7   : > { %v3895_v12 = vpop.permute.xlu0 %945  ;;  %v4462_v37 = vld [vmem:[#allocation12_spill] sm:$0xff] }
 0x2a8   : > { %v1791_v53 = vmax.f32 %v1785_v35, 0.0  ;;  %v1790_v43 = vmax.f32 %v1784_v16, 0.0  ;;  %v603_v35 = vsel %vm593_vm1, %v4461_v61, %v4462_v37 }
 0x2aa   : > { %v3897_v58 = vpop.permute.xlu1 %947  ;;  %v1851_v1 = vpack.c.bf16 %v1791_v53, %v1791_v53  ;;  %v1850_v54 = vpack.c.bf16 %v1790_v43, %v1790_v43  ;;  %v2032_v43 = vld [vmem:[%s4261_s3 + $0xf0] sm:$0xff] }
 0x2ab   : > { %v3899_v45 = vpop.permute.xlu0 %957 }
 0x2ac   : > { %2112 = vmatprep.subr.msk.bf16.mxu1 %vm4456_vm12, %v1851_v1  ;;  %v1856_v2 = vsel %vm4457_vm6, %v1850_v54, 0  ;;  %v2033_v1 = vld [vmem:[%s4261_s3 + $0xf8] sm:$0xff]  ;;  %v4463_v54 = vld [vmem:[#allocation17_spill] sm:$0xff] }
 0x2ad   : > { %1874 = vmatpush1.bf16.msra.mxu1 %v1856_v2  ;;  %v4464_v2 = vld [vmem:[#allocation13_spill] sm:$0xff] }
 0x2ae   : > { %v3903_v38 = vpop.permute.xlu1 %959 }
 0x2af   : > { %v1605_v3 = vpop.permute.xlu0 %1604 }
 0x2b2   : > { %v1607_v49 = vpop.permute.xlu1 %1606 }
 0x2b3   : > { %v1611_v11 = vpop.permute.xlu0 %1610 }
 0x2b4   : > { %v1617_v8 = vsel %vm1616_vm15, %v1605_v3, %v1611_v11  ;;  %v1620_v18 = vsel %vm1616_vm15, %v1611_v11, %v1605_v3  ;;  %v671_v3 = vsel %vm667_vm2, %v4464_v2, %v4463_v54  ;;  %v520_v11 = vld [vmem:[%s4261_s3 + $0x38] sm:$0xff] }
 0x2b5   : > { %v1630_v50 = vmul.f32 %v1624_v7, %v1617_v8  ;;  %v1631_v0 = vmul.f32 %v1625_v21, %v1620_v18  ;;  %v521_v7 = vld [vmem:[%s4261_s3 + $0x40] sm:$0xff]  ;;  %v519_v21 = vld [vmem:[%s4261_s3 + $0x30] sm:$0xff]  ;;  %v522_v8 = vld [vmem:[%s4261_s3 + $0x48] sm:$0xff] }
 0x2b6   : > { %v1613_v17 = vpop.permute.xlu1 %1612 }
 0x2b7   : > { %v3910_v23 = vadd.f32 %v1630_v50, %v3818_v46  ;;  %v3913_v9 = vadd.f32 %v1631_v0, %v3821_v41  ;;  %v1618_v27 = vsel %vm1616_vm15, %v1607_v49, %v1613_v17  ;;  %v1621_v22 = vsel %vm1616_vm15, %v1613_v17, %v1607_v49  ;;  %v1643_v10 = vpop.permute.xlu0 %1642 }
 0x2b8   : > { %v1632_v36 = vmul.f32 %v1626_v57, %v1618_v27  ;;  %v1633_v29 = vmul.f32 %v1627_v33, %v1621_v22  ;;  %v677_v49 = vsel %vm667_vm2, %v4463_v54, %v4464_v2  ;;  %v625_v57 = vmul.f32 %v2020_v56, %v603_v35  ;;  %v4472_v56 = vld [vmem:[#allocation52_spill] sm:$0xff]  ;;  %v4475_v54 = vld [vmem:[#allocation46_spill] sm:$0xff] }
 0x2b9   : > { %v699_v27 = vmul.f32 %v2032_v43, %v677_v49  ;;  %v700_v22 = vmul.f32 %v2033_v1, %v671_v3  ;;  %v2035_v43 = vld [vmem:[%s4261_s3 + $0x108] sm:$0xff]  ;;  %v4474_v1 = vld [vmem:[#allocation53_spill] sm:$0xff] }
 0x2ba   : > { %v3920_v24 = vadd.f32 %v1632_v36, %v3828_v20  ;;  %v3923_v31 = vadd.f32 %v1633_v29, %v3831_v59  ;;  %v1645_v46 = vpop.permute.xlu1 %1644  ;;  %v532_v36 = vmul.f32 %v520_v11, %v2475_v47  ;;  %v3997_v29 = vmul.f32 %v521_v7, %v2493_v51  ;;  %v2056_v51 = vld [vmem:[%s4261_s3 + $0x1b0] sm:$0xff] }
 0x2bb   : > { %v1649_v41 = vpop.permute.xlu0 %1648  ;;  %v672_v2 = vsel %vm667_vm2, %v4475_v54, %v4474_v1  ;;  %v678_v3 = vsel %vm667_vm2, %v4474_v1, %v4475_v54  ;;  %v4480_v1 = vld [vmem:[#allocation6_spill] sm:$0xff] }
 0x2bc   : > { %4458 = vst [vmem:[#allocation22_spill] sm:$0xff] %v3923_v31  ;;  %v1655_v34 = vsel %vm1654_vm10, %v1643_v10, %v1649_v41  ;;  %v1658_v25 = vsel %vm1654_vm10, %v1649_v41, %v1643_v10  ;;  %v531_v10 = vmul.f32 %v519_v21, %v2457_v44  ;;  %v4469_v41 = vld [vmem:[#allocation19_spill] sm:$0xff] }
 0x2bd   : > { %v1668_v48 = vmul.f32 %v1662_v19, %v1655_v34  ;;  %v1669_v13 = vmul.f32 %v1663_v26, %v1658_v25  ;;  %v4467_v19 = vld [vmem:[#allocation18_spill] sm:$0xff]  ;;  %v4470_v34 = vld [vmem:[#allocation15_spill] sm:$0xff] }
 0x2be   : > { %v1651_v28 = vpop.permute.xlu1 %1650  ;;  %v4468_v26 = vld [vmem:[#allocation14_spill] sm:$0xff]  ;;  %v819_v25 = vsel %vm815_vm7, %v4470_v34, %v4469_v41  ;;  %v711_v35 = vadd.f32 %v699_v27, %v531_v10  ;;  %v4477_v10 = vld [vmem:[#allocation48_spill] sm:$0xff] }
 0x2bf   : > { %v3930_v20 = vadd.f32 %v1668_v48, %v3841_v4  ;;  %v3933_v59 = vadd.f32 %v1669_v13, %v3844_v32  ;;  %v1656_v42 = vsel %vm1654_vm10, %v1645_v46, %v1651_v28  ;;  %v1659_v39 = vsel %vm1654_vm10, %v1651_v28, %v1645_v46  ;;  %v3939_v55 = vpop.permute.xlu0 %1019  ;;  %v2021_v4 = vld [vmem:[%s4261_s3 + $0x98] sm:$0xff]  ;;  %v2047_v27 = vld [vmem:[%s4261_s3 + $0x168] sm:$0xff] }
 0x2c0   : > { %v597_v32 = vsel %vm593_vm1, %v4462_v37, %v4461_v61  ;;  %v1670_v16 = vmul.f32 %v1664_v40, %v1656_v42  ;;  %v1671_v53 = vmul.f32 %v1665_v5, %v1659_v39  ;;  %v2045_v46 = vld [vmem:[%s4261_s3 + $0x158] sm:$0xff]  ;;  %v745_v44 = vsel %vm741_vm3, %v4468_v26, %v4467_v19  ;;  %v4471_v40 = vld [vmem:[#allocation5_spill] sm:$0xff]  ;;  %v2023_v39 = vld [vmem:[%s4261_s3 + $0xa8] sm:$0xff] }
 0x2c1   : > { %4459 = vst [vmem:[#allocation57_spill] sm:$0xff] %v3930_v20  ;;  %4460 = vst [vmem:[#allocation47_spill] sm:$0xff] %v3933_v59  ;;  %v626_v33 = vmul.f32 %v2021_v4, %v597_v32  ;;  %v751_v47 = vsel %vm741_vm3, %v4467_v19, %v4468_v26  ;;  %v825_v48 = vsel %vm815_vm7, %v4469_v41, %v4470_v34  ;;  %v2022_v42 = vld [vmem:[%s4261_s3 + $0xa0] sm:$0xff]  ;;  %v4473_v4 = vld [vmem:[#allocation44_spill] sm:$0xff] }
 0x2c2   : > { %v3982_v18 = vadd.f32 %v1670_v16, %v3867_v14  ;;  %v3985_v50 = vadd.f32 %v1671_v53, %v3870_v30  ;;  %v3987_v0 = vpop.permute.xlu1 %1021  ;;  %v2044_v14 = vld [vmem:[%s4261_s3 + $0x150] sm:$0xff]  ;;  %v4000_v30 = vmul.f32 %v522_v8, %v2535_v62  ;;  %v2057_v62 = vld [vmem:[%s4261_s3 + $0x1b8] sm:$0xff]  ;;  %v637_v5 = vadd.f32 %v625_v57, %v4471_v40  ;;  %v2034_v53 = vld [vmem:[%s4261_s3 + $0x100] sm:$0xff] }
 0x2c3   : > { %v3989_v17 = vpop.permute.xlu0 %1031  ;;  %v638_v28 = vadd.f32 %v626_v33, %v4471_v40  ;;  %v598_v61 = vsel %vm593_vm1, %v4473_v4, %v4472_v56  ;;  %v604_v37 = vsel %vm593_vm1, %v4472_v56, %v4473_v4  ;;  %v712_v16 = vadd.f32 %v700_v22, %v532_v36  ;;  %v2046_v33 = vld [vmem:[%s4261_s3 + $0x160] sm:$0xff]  ;;  %v4476_v22 = vld [vmem:[#allocation54_spill] sm:$0xff]  ;;  %v2069_v40 = vld [vmem:[%s4261_s3 + $0x218] sm:$0xff] }
 0x2c4   : > { %4465 = vst [vmem:[#allocation35_spill] sm:$0xff] %v3982_v18  ;;  %4466 = vst [vmem:[#allocation23_spill] sm:$0xff] %v3985_v50  ;;  %v773_v49 = vmul.f32 %v2044_v14, %v751_v47  ;;  %v774_v7 = vmul.f32 %v2045_v46, %v745_v44  ;;  %v847_v21 = vmul.f32 %v2056_v51, %v825_v48  ;;  %v2058_v44 = vld [vmem:[%s4261_s3 + $0x1c0] sm:$0xff]  ;;  %v2059_v47 = vld [vmem:[%s4261_s3 + $0x1c8] sm:$0xff] }
 0x2c5   : > { %v848_v11 = vmul.f32 %v2057_v62, %v819_v25  ;;  %v627_v8 = vmul.f32 %v2022_v42, %v604_v37  ;;  %v628_v57 = vmul.f32 %v2023_v39, %v598_v61  ;;  %v746_v36 = vsel %vm741_vm3, %v4477_v10, %v4476_v22  ;;  %v4478_v51 = vld [vmem:[#allocation55_spill] sm:$0xff]  ;;  %v4479_v62 = vld [vmem:[#allocation50_spill] sm:$0xff]  ;;  %v2070_v56 = vld [vmem:[%s4261_s3 + $0x220] sm:$0xff] }
 0x2c6   : > { %v4027_v13 = vpop.permute.xlu1 %1033  ;;  %v752_v14 = vsel %vm741_vm3, %v4476_v22, %v4477_v10  ;;  %v701_v19 = vmul.f32 %v2034_v53, %v678_v3  ;;  %v702_v26 = vmul.f32 %v2035_v43, %v672_v2  ;;  %v820_v41 = vsel %vm815_vm7, %v4479_v62, %v4478_v51  ;;  %v2068_v25 = vld [vmem:[%s4261_s3 + $0x210] sm:$0xff]  ;;  %v2071_v4 = vld [vmem:[%s4261_s3 + $0x228] sm:$0xff]  ;;  %vm4481_vm1 = vmmov %vm4448_vm13 }
 0x2c7   : > { %v4045_v32 = vpop.permute.xlu0 %1093  ;;  %v826_v34 = vsel %vm815_vm7, %v4478_v51, %v4479_v62  ;;  %v893_v42 = vsel %vm889_vm4, %v3883_v63, %v3889_v15  ;;  %v899_v39 = vsel %vm889_vm4, %v3889_v15, %v3883_v63  ;;  %v894_v61 = vsel %vm889_vm4, %v3887_v60, %v3891_v6  ;;  %vm4482_vm2 = vmmov %vm4481_vm1 }
 0x2c8   : > { %v900_v37 = vsel %vm889_vm4, %v3891_v6, %v3887_v60  ;;  %v785_v53 = vadd.f32 %v773_v49, %v637_v5  ;;  %v786_v63 = vadd.f32 %v774_v7, %v638_v28  ;;  %v775_v15 = vmul.f32 %v2046_v33, %v752_v14  ;;  %v2080_v49 = vld [vmem:[%s4261_s3 + $0x270] sm:$0xff]  ;;  %v2081_v7 = vld [vmem:[%s4261_s3 + $0x278] sm:$0xff]  ;;  %v1701_v33 = vld [vmem:[#allocation2 + $0x2a8] sm:$0xff] }
 0x2c9   : > { %v776_v43 = vmul.f32 %v2047_v27, %v746_v36  ;;  %v639_v54 = vadd.f32 %v627_v8, %v4480_v1  ;;  %v640_v2 = vadd.f32 %v628_v57, %v4480_v1  ;;  %v849_v3 = vmul.f32 %v2058_v44, %v826_v34  ;;  %v1700_v57 = vld [vmem:[#allocation2 + $0x2a0] sm:$0xff]  ;;  %vm4483_vm3 = vmmov %vm4481_vm1 }
 0x2ca   : > { %v4075_v46 = vpop.permute.xlu1 %1095  ;;  %v850_v22 = vmul.f32 %v2059_v47, %v820_v41  ;;  %v921_v51 = vmul.f32 %v2068_v25, %v893_v42  ;;  %v922_v62 = vmul.f32 %v2069_v40, %v899_v39  ;;  %v923_v50 = vmul.f32 %v2070_v56, %v894_v61  ;;  %v1702_v42 = vld [vmem:[#allocation2 + $0x2b0] sm:$0xff]  ;;  %v1703_v39 = vld [vmem:[#allocation2 + $0x2b8] sm:$0xff]  ;;  %vm4484_vm4 = vmmov %vm4481_vm1 }
 0x2cb   : > { %v1106_v48 = vpop.permute.xlu0 %1105  ;;  %v924_v18 = vmul.f32 %v2071_v4, %v900_v37  ;;  %v4121_v20 = vadd.f32 %v847_v21, %v711_v35  ;;  %v4123_v31 = vadd.f32 %v848_v11, %v712_v16  ;;  %v713_v60 = vadd.f32 %v701_v19, %v3997_v29  ;;  %v2083_v11 = vld [vmem:[%s4261_s3 + $0x288] sm:$0xff]  ;;  %vm4486_vm7 = vmmov %vm4446_vm0 }
 0x2cc   : > { %v714_v6 = vadd.f32 %v702_v26, %v4000_v30  ;;  %v787_v5 = vadd.f32 %v775_v15, %v639_v54  ;;  %v788_v28 = vadd.f32 %v776_v43, %v640_v2  ;;  %v967_v35 = vsel %vm963_vm5, %v3895_v12, %v3899_v45  ;;  %v2082_v30 = vld [vmem:[%s4261_s3 + $0x280] sm:$0xff]  ;;  %vm4487_vm13 = vmmov %vm4446_vm0 }
 0x2cd   : > { %v973_v29 = vsel %vm963_vm5, %v3899_v45, %v3895_v12  ;;  %v861_v16 = vadd.f32 %v849_v3, %v713_v60  ;;  %v968_v8 = vsel %vm963_vm5, %v3897_v58, %v3903_v38  ;;  %v974_v12 = vsel %vm963_vm5, %v3903_v38, %v3897_v58  ;;  %vm4485_vm5 = vmmov %vm4446_vm0  ;;  %v2093_v3 = vld [vmem:[%s4261_s3 + $0x2d8] sm:$0xff] }
 0x2ce   : > { %v1108_v10 = vpop.permute.xlu1 %1107  ;;  %v862_v21 = vadd.f32 %v850_v22, %v714_v6  ;;  %v4155_v27 = vadd.f32 %v921_v51, %v785_v53  ;;  %v4157_v36 = vadd.f32 %v922_v62, %v786_v63  ;;  %v4159_v14 = vadd.f32 %v923_v50, %v787_v5  ;;  %v2105_v50 = vld [vmem:[%s4261_s3 + $0x338] sm:$0xff]  ;;  %v2106_v53 = vld [vmem:[%s4261_s3 + $0x340] sm:$0xff]  ;;  %v2107_v63 = vld [vmem:[%s4261_s3 + $0x348] sm:$0xff] }
 0x2cf   : > { %v1681_v59 = vpop.permute.xlu0 %1680  ;;  %v4161_v19 = vadd.f32 %v924_v18, %v788_v28  ;;  %v995_v44 = vmul.f32 %v2080_v49, %v967_v35  ;;  %v996_v47 = vmul.f32 %v2081_v7, %v973_v29  ;;  %v997_v38 = vmul.f32 %v2082_v30, %v968_v8  ;;  %v2104_v18 = vld [vmem:[%s4261_s3 + $0x330] sm:$0xff]  ;;  %v2094_v22 = vld [vmem:[%s4261_s3 + $0x2e0] sm:$0xff]  ;;  %v2095_v62 = vld [vmem:[%s4261_s3 + $0x2e8] sm:$0xff] }
 0x2d0   : > { %v998_v34 = vmul.f32 %v2083_v11, %v974_v12  ;;  %v1115_v56 = vsel %vm4481_vm1, %v4045_v32, %v1106_v48  ;;  %v1116_v4 = vsel %vm4483_vm3, %v4075_v46, %v1108_v10  ;;  %v1122_v61 = vsel %vm4484_vm4, %v1108_v10, %v4075_v46  ;;  %v4488_v28 = vld [vmem:[#allocation22_spill] sm:$0xff]  ;;  %v1738_v35 = vld [vmem:[#allocation2 + $0x2d0] sm:$0xff]  ;;  %v1739_v29 = vld [vmem:[#allocation2 + $0x2d8] sm:$0xff] }
 0x2d1   : > { %v1041_v1 = vsel %vm4485_vm5, %v3939_v55, %v3989_v17  ;;  %v1047_v54 = vsel %vm4486_vm7, %v3989_v17, %v3939_v55  ;;  %v1042_v10 = vsel %vm4446_vm0, %v3987_v0, %v4027_v13  ;;  %v1048_v55 = vsel %vm4487_vm13, %v4027_v13, %v3987_v0 }
 0x2d2   : > { %v1683_v45 = vpop.permute.xlu1 %1682  ;;  %v1143_v17 = vmul.f32 %v2104_v18, %v1115_v56  ;;  %v1145_v60 = vmul.f32 %v2106_v53, %v1116_v4  ;;  %v1146_v6 = vmul.f32 %v2107_v63, %v1122_v61  ;;  %v1007_v30 = vadd.f32 %v995_v44, %v4121_v20 }
 0x2d3   : > { %v1687_v26 = vpop.permute.xlu0 %1686  ;;  %v1008_v11 = vadd.f32 %v996_v47, %v4123_v31  ;;  %v1009_v0 = vadd.f32 %v997_v38, %v861_v16  ;;  %v1010_v13 = vadd.f32 %v998_v34, %v862_v21  ;;  %v4489_v47 = vld [vmem:[#allocation57_spill] sm:$0xff]  ;;  %v4490_v34 = vld [vmem:[#allocation47_spill] sm:$0xff] }
 0x2d4   : > { %v1693_v41 = vsel %vm1692_vm11, %v1681_v59, %v1687_v26  ;;  %v1696_v58 = vsel %vm1692_vm11, %v1687_v26, %v1681_v59  ;;  %v1121_v59 = vsel %vm4482_vm2, %v1106_v48, %v4045_v32  ;;  %v1072_v26 = vmul.f32 %v2095_v62, %v1048_v55  ;;  %v2171_v62 = vld [vmem:[%s2329_s22] sm:$0xff] }
 0x2d5   : > { %v1706_v25 = vmul.f32 %v1700_v57, %v1693_v41  ;;  %v1707_v40 = vmul.f32 %v1701_v33, %v1696_v58  ;;  %v1144_v51 = vmul.f32 %v2105_v50, %v1121_v59  ;;  %v1071_v33 = vmul.f32 %v2094_v22, %v1042_v10 }
 0x2d6   : > { %v1689_v37 = vpop.permute.xlu1 %1688  ;;  %v1155_v20 = vadd.f32 %v1143_v17, %v1007_v30  ;;  %v1157_v31 = vadd.f32 %v1145_v60, %v1009_v0  ;;  %v1158_v16 = vadd.f32 %v1146_v6, %v1010_v13  ;;  %v1916_v60 = vunpack.c.l.bf16 %v2171_v62  ;;  %v2172_v13 = vld [vmem:[%s2329_s22 + $0x8] sm:$0xff] }
 0x2d7   : > { %v1712_v15 = vadd.f32 %v1706_v25, %v3910_v23  ;;  %v1713_v32 = vadd.f32 %v1707_v40, %v3913_v9  ;;  %v1694_v48 = vsel %vm1692_vm11, %v1683_v45, %v1689_v37  ;;  %v1697_v43 = vsel %vm1692_vm11, %v1689_v37, %v1683_v45  ;;  %v1719_v46 = vpop.permute.xlu0 %1718  ;;  %v2092_v9 = vld [vmem:[%s4261_s3 + $0x2d0] sm:$0xff]  ;;  %v1740_v25 = vld [vmem:[#allocation2 + $0x2e0] sm:$0xff]  ;;  %v1741_v40 = vld [vmem:[#allocation2 + $0x2e8] sm:$0xff] }
 0x2d8   : > { %v1708_v23 = vmul.f32 %v1702_v42, %v1694_v48  ;;  %v1709_v2 = vmul.f32 %v1703_v39, %v1697_v43  ;;  %v1069_v12 = vmul.f32 %v2092_v9, %v1041_v1  ;;  %v1070_v45 = vmul.f32 %v2093_v3, %v1047_v54  ;;  %v4492_v54 = vld [vmem:[#allocation23_spill] sm:$0xff] }
 0x2d9   : > { %v1156_v44 = vadd.f32 %v1144_v51, %v1008_v11  ;;  %v1083_v61 = vadd.f32 %v1071_v33, %v4159_v14  ;;  %v1084_v37 = vadd.f32 %v1072_v26, %v4161_v19  ;;  %v368_v51 = vld [vmem:[%s4265_s7] sm:$0xf] }
 0x2da   : > { %v1714_v5 = vadd.f32 %v1708_v23, %v3920_v24  ;;  %v1715_v49 = vadd.f32 %v1709_v2, %v4488_v28  ;;  %v1721_v7 = vpop.permute.xlu1 %1720  ;;  %v1081_v50 = vadd.f32 %v1069_v12, %v4155_v27  ;;  %v1082_v56 = vadd.f32 %v1070_v45, %v4157_v36 }
 0x2db   : > { %v1725_v8 = vpop.permute.xlu0 %1724  ;;  %v1770_v52 = vadd.f32 %v1157_v31, %v1083_v61  ;;  %v1771_v2 = vadd.f32 %v1158_v16, %v1084_v37 }
 0x2dc   : > { %v1731_v57 = vsel %vm1730_vm9, %v1719_v46, %v1725_v8  ;;  %v1734_v24 = vsel %vm1730_vm9, %v1725_v8, %v1719_v46  ;;  %v1768_v48 = vadd.f32 %v1155_v20, %v1081_v50  ;;  %v1769_v43 = vadd.f32 %v1156_v44, %v1082_v56  ;;  %v4491_v46 = vld [vmem:[#allocation35_spill] sm:$0xff] }
 0x2dd   : > { %v1744_v41 = vmul.f32 %v1738_v35, %v1731_v57  ;;  %v1745_v58 = vmul.f32 %v1739_v29, %v1734_v24  ;;  %v1918_v8 = vunpack.c.l.bf16 %v2172_v13  ;;  %v1919_v24 = vunpack.c.h.bf16 %v2172_v13 }
 0x2de   : > { %v1727_v21 = vpop.permute.xlu1 %1726 }
 0x2df   : > { %v1750_v38 = vadd.f32 %v1744_v41, %v4489_v47  ;;  %v1751_v42 = vadd.f32 %v1745_v58, %v4490_v34  ;;  %v1732_v39 = vsel %vm1730_vm9, %v1721_v7, %v1727_v21  ;;  %v1735_v18 = vsel %vm1730_vm9, %v1727_v21, %v1721_v7 }
 0x2e0   : > { %v1746_v59 = vmul.f32 %v1740_v25, %v1732_v39  ;;  %v1747_v4 = vmul.f32 %v1741_v40, %v1735_v18 }
 0x2e1   : > { %v1774_v53 = vadd.f32 %v1750_v38, %v1712_v15  ;;  %v1775_v63 = vadd.f32 %v1751_v42, %v1713_v32 }
 0x2e2   : > { %v1752_v1 = vadd.f32 %v1746_v59, %v4491_v46  ;;  %v1753_v23 = vadd.f32 %v1747_v4, %v4492_v54 }
 0x2e3   : > { %v1780_v9 = vadd.f32 %v1774_v53, %v1768_v48  ;;  %v1781_v3 = vadd.f32 %v1775_v63, %v1769_v43 }
 0x2e4   : > { %v1776_v27 = vadd.f32 %v1752_v1, %v1714_v5  ;;  %v1777_v36 = vadd.f32 %v1753_v23, %v1715_v49  ;;  %v1917_v49 = vunpack.c.h.bf16 %v2171_v62 }
 0x2e5   : > { %v1786_v10 = vmax.f32 %v1780_v9, 0.0  ;;  %v1787_v15 = vmax.f32 %v1781_v3, 0.0 }
 0x2e6   : > { %v1782_v22 = vadd.f32 %v1776_v27, %v1770_v52  ;;  %v1783_v14 = vadd.f32 %v1777_v36, %v1771_v2 }
 0x2e8   : > { %v1788_v19 = vmax.f32 %v1782_v22, 0.0  ;;  %v1789_v32 = vmax.f32 %v1783_v14, 0.0  ;;  %v1905_v6 = vpop.permute.xlu0 %1904 }
 0x2ea   : > { %v1849_v55 = vpack.c.bf16 %v1789_v32, %v1787_v15  ;;  %v1848_v17 = vpack.c.bf16 %v1788_v19, %v1786_v10 }
 0x2eb   : > { %v1910_v12 = vpop.permute.xlu1 %1909 }
 0x2ec   : > { %1875 = vmatprep.subr.bf16.mxu1 %v1849_v55 }
 0x2ed   : > { %1876 = vmatpush1.bf16.msra.mxu1 %v1848_v17 }
 0x2f0   : > { %2113 = vmatmul.mubr.msk.bf16.vlgmr.msra.gmra.mxu1 %vm1796_vm8, %v368_v51 }
 0x337   : > { %v1841_v5 = vpop.f32.mrf.mxu1 }
 0x338   : > { %v1912_v28 = vadd.f32 %v1905_v6, %v1841_v5 }
 0x339   : > { %v1843_v7 = vpop.f32.mrf.mxu1 }
 0x33a   : > { %v1920_v35 = vadd.f32 %v1916_v60, %v1912_v28  ;;  %v1913_v29 = vadd.f32 %v1905_v6, %v1843_v7 }
 0x33b   : > { %v1845_v30 = vpop.f32.mrf.mxu1 }
 0x33c   : > { %1924 = vst [vmem:[%s347_s14] sm:$0xff] %v1920_v35  ;;  %v1921_v11 = vadd.f32 %v1917_v49, %v1913_v29 }
 0x33d   : > { %v1846_v0 = vpop.f32.mrf.mxu1 }
 0x33e   : > { %1925 = vst [vmem:[%s347_s14 + $0x8] sm:$0xff] %v1921_v11 }
 0x3b0   : > { %v1895_v45 = vpop.f32.mrf.mxu1 }
 0x3b1   : > { %v1914_v57 = vadd.f32 %v1910_v12, %v1895_v45 }
 0x3b2   : > { %v1897_v33 = vpop.f32.mrf.mxu1 }
 0x3b3   : > { %v1922_v26 = vadd.f32 %v1918_v8, %v1914_v57  ;;  %v1915_v41 = vadd.f32 %v1910_v12, %v1897_v33 }
 0x3b4   : > { %v1899_v58 = vpop.f32.mrf.mxu1 }
 0x3b5   : > { %1926 = vst [vmem:[%s347_s14 + $0x10] sm:$0xff] %v1922_v26  ;;  %v1923_v25 = vadd.f32 %v1919_v24, %v1915_v41 }
 0x3b6   : > { %v1900_v40 = vpop.f32.mrf.mxu1 }
 0x3b7   : > { %1927 = vst [vmem:[%s347_s14 + $0x18] sm:$0xff] %v1923_v25 }
 0x3b8 PF: > { %s20_s30 = sadd.s32 1, %s2209_s30  }
 0x3b9   : > { %p17_p1 = scmp.ge.s32.totalorder %s20_s30, 4  }
 0x3bb   :  { %19 = sbr.rel (!%p17_p1) target bundleno = 1 (0x1), region = 114 }
 0x3c0   :  { %1949 = vsyncpa [#allocation3], 1 }
 0x3c1   :  { %1951 = vsyncpa [#allocation3 + $0x1], 1 }

</bundles_post_ra>
